<compile_context>
chip_gen: v7x
topology: tpu7x:2x2x1
jax: 0.10.0
libtpu: 0.0.40
codegen_flags: <defaults>
</compile_context>

<pallas_src>
import functools

import jax
import jax.numpy as jnp
from jax.experimental import pallas as pl
from jax.experimental.pallas import tpu as pltpu


def _leaky(v, slope=0.2):
    return jnp.where(v >= 0, v, slope * v)


def _resnet_block_kernel(xp_ref, w3_ref, b3_ref, w1_ref, b1_ref, ws_ref, bs_ref,
                         o_ref, *, dilation, l_out):
    """Fused ResnetBlock for one batch element, NCL layout.

    xp_ref : (1, C, L + 2*dilation)  reflection-padded input, f32
    w3_ref : (C, 3*C) bf16  tap-grouped dilated-conv weight (Cout, K*Cin)
    b3_ref : (C, 1)   f32
    w1_ref : (C, C)   bf16  1x1 conv weight (Cout, Cin)
    b1_ref : (C, 1)   f32
    ws_ref : (C, C)   bf16  1x1 shortcut conv weight
    bs_ref : (C, 1)   f32
    o_ref  : (1, C, L) f32
    """
    xp = xp_ref[0]                                   # (C, Lp) f32
    x = xp[:, dilation:dilation + l_out]             # original (unpadded) input

    # --- block: LeakyReLU -> dilated K=3 conv as ONE tap-grouped matmul ---
    hp = _leaky(xp)
    taps = [hp[:, k * dilation:k * dilation + l_out] for k in range(3)]
    hcat = jnp.concatenate(taps, axis=0).astype(jnp.bfloat16)      # (3C, L)
    h = jnp.dot(w3_ref[...], hcat, preferred_element_type=jnp.float32)
    h = h + b3_ref[...]

    # --- LeakyReLU -> 1x1 conv ---
    h = _leaky(h)
    y = jnp.dot(w1_ref[...], h.astype(jnp.bfloat16),
                preferred_element_type=jnp.float32) + b1_ref[...]

    # --- shortcut 1x1 conv, fused residual add ---
    s = jnp.dot(ws_ref[...], x.astype(jnp.bfloat16),
                preferred_element_type=jnp.float32) + bs_ref[...]

    o_ref[0] = (s + y).astype(o_ref.dtype)


def pack_params(p):
    """Convert torch-layout ResnetBlock weights to the kernel's packed layout.

    Done ONCE (not per forward): matmul weights go to bf16 for the MXU, biases
    stay f32, and the dilated-conv weight (Cout, Cin, K) is tap-grouped into
    (Cout, K*Cin) so the conv is a single fat-contraction matmul.
    """
    c = p["conv3_w"].shape[0]
    w3g = jnp.transpose(p["conv3_w"], (0, 2, 1)).reshape(c, 3 * c)  # [co, k*C+ci]
    return {
        "w3": w3g.astype(jnp.bfloat16),
        "b3": p["conv3_b"].reshape(c, 1).astype(jnp.float32),
        "w1": p["conv1_w"][:, :, 0].astype(jnp.bfloat16),
        "b1": p["conv1_b"].reshape(c, 1).astype(jnp.float32),
        "ws": p["short_w"][:, :, 0].astype(jnp.bfloat16),
        "bs": p["short_b"].reshape(c, 1).astype(jnp.float32),
    }


@functools.partial(jax.jit, static_argnames=("dilation",))
def resnet_block_pallas(x, packed, *, dilation=1):
    """x: (B, C, L) f32 (same NCL layout as the PyTorch module). Returns (B, C, L) f32."""
    b, c, l = x.shape
    # Reflection pad is glue; leaky is elementwise so it commutes with padding.
    xp = jnp.pad(x, ((0, 0), (0, 0), (dilation, dilation)), mode="reflect")
    lp = l + 2 * dilation

    kernel = functools.partial(_resnet_block_kernel, dilation=dilation, l_out=l)
    return pl.pallas_call(
        kernel,
        out_shape=jax.ShapeDtypeStruct((b, c, l), jnp.float32),
        grid=(b,),
        in_specs=[
            pl.BlockSpec((1, c, lp), lambda i: (i, 0, 0)),   # padded activations
            pl.BlockSpec((c, 3 * c), lambda i: (0, 0)),      # w3 (tap-grouped)
            pl.BlockSpec((c, 1), lambda i: (0, 0)),          # b3
            pl.BlockSpec((c, c), lambda i: (0, 0)),          # w1
            pl.BlockSpec((c, 1), lambda i: (0, 0)),          # b1
            pl.BlockSpec((c, c), lambda i: (0, 0)),          # ws
            pl.BlockSpec((c, 1), lambda i: (0, 0)),          # bs
        ],
        out_specs=pl.BlockSpec((1, c, l), lambda i: (i, 0, 0)),
        compiler_params=pltpu.CompilerParams(
            dimension_semantics=("parallel",)),              # megacore on v7x
    )(xp, packed["w3"], packed["b3"], packed["w1"], packed["b1"],
      packed["ws"], packed["bs"])


def resnet_block_ref(x, p, dilation=1):
    """Pure-JAX f32 reference mirroring the PyTorch ResnetBlock forward."""
    l = x.shape[-1]
    h = _leaky(x)
    hp = jnp.pad(h, ((0, 0), (0, 0), (dilation, dilation)), mode="reflect")
    h = sum(jnp.einsum("oc,bcl->bol", p["conv3_w"][:, :, k],
                       hp[:, :, k * dilation:k * dilation + l]) for k in range(3))
    h = h + p["conv3_b"][None, :, None]
    h = _leaky(h)
    h = jnp.einsum("oc,bcl->bol", p["conv1_w"][:, :, 0], h) + p["conv1_b"][None, :, None]
    s = jnp.einsum("oc,bcl->bol", p["short_w"][:, :, 0], x) + p["short_b"][None, :, None]
    return s + h


if __name__ == "__main__":
    key = jax.random.PRNGKey(0)
    kx, k1, k2, k3, k4, k5, k6 = jax.random.split(key, 7)

    # Small shapes consistent with the module: batch=2, dim=128 channels,
    # sequence length 256, dilation=3 (the "3**j" schedule's second block).
    B, C, L, DIL = 2, 128, 256, 3
    x = jax.random.normal(kx, (B, C, L), jnp.float32)

    params = {
        "conv3_w": 0.05 * jax.random.normal(k1, (C, C, 3), jnp.float32),
        "conv3_b": 0.01 * jax.random.normal(k2, (C,), jnp.float32),
        "conv1_w": 0.05 * jax.random.normal(k3, (C, C, 1), jnp.float32),
        "conv1_b": 0.01 * jax.random.normal(k4, (C,), jnp.float32),
        "short_w": 0.05 * jax.random.normal(k5, (C, C, 1), jnp.float32),
        "short_b": 0.01 * jax.random.normal(k6, (C,), jnp.float32),
    }
    packed = pack_params(params)

    out = resnet_block_pallas(x, packed, dilation=DIL)
    out = jax.block_until_ready(out)

    assert out.shape == (B, C, L), out.shape
    assert bool(jnp.all(jnp.isfinite(out)))

    # Validate against a pure-JAX f32 reference; bf16 MXU inputs with f32
    # accumulation keep the delta well under this tolerance.
    ref = resnet_block_ref(x, params, dilation=DIL)
    max_err = float(jnp.max(jnp.abs(out - ref)))
    assert max_err < 5e-2, f"max abs err {max_err}"

    print("KERNEL_OK")
</pallas_src>

<mosaic_0001>
module attributes {stable_mosaic.version = 11 : i64} {
  func.func @_resnet_block_kernel(%arg0: i32, %arg1: memref<1x128x262xf32, #tpu.memory_space<vmem>>, %arg2: memref<128x384xbf16, #tpu.memory_space<vmem>>, %arg3: memref<128x1xf32, #tpu.memory_space<vmem>>, %arg4: memref<128x128xbf16, #tpu.memory_space<vmem>>, %arg5: memref<128x1xf32, #tpu.memory_space<vmem>>, %arg6: memref<128x128xbf16, #tpu.memory_space<vmem>>, %arg7: memref<128x1xf32, #tpu.memory_space<vmem>>, %arg8: memref<1x128x256xf32, #tpu.memory_space<vmem>>) attributes {dimension_semantics = [#tpu.dimension_semantics<parallel>], iteration_bounds = array<i64: 2>, scalar_prefetch = 0 : i64, scratch_operands = 0 : i64, tpu.core_type = #tpu.core_type<tc>, window_params = [{transform_indices = @transform_0, window_bounds = array<i64: 1, 128, 262>}, {pipeline_mode = #tpu.pipeline_mode<synchronous>, transform_indices = @transform_1, window_bounds = array<i64: 128, 384>}, {pipeline_mode = #tpu.pipeline_mode<synchronous>, transform_indices = @transform_2, window_bounds = array<i64: 128, 1>}, {pipeline_mode = #tpu.pipeline_mode<synchronous>, transform_indices = @transform_3, window_bounds = array<i64: 128, 128>}, {pipeline_mode = #tpu.pipeline_mode<synchronous>, transform_indices = @transform_4, window_bounds = array<i64: 128, 1>}, {pipeline_mode = #tpu.pipeline_mode<synchronous>, transform_indices = @transform_5, window_bounds = array<i64: 128, 128>}, {pipeline_mode = #tpu.pipeline_mode<synchronous>, transform_indices = @transform_6, window_bounds = array<i64: 128, 1>}, {transform_indices = @transform_7, window_bounds = array<i64: 1, 128, 256>}]} {
    %c0 = arith.constant 0 : index
    %c0_0 = arith.constant 0 : index
    %c0_1 = arith.constant 0 : index
    %0 = vector.load %arg1[%c0, %c0_0, %c0_1] : memref<1x128x262xf32, #tpu.memory_space<vmem>>, vector<1x128x262xf32>
    %1 = vector.shape_cast %0 : vector<1x128x262xf32> to vector<128x262xf32>
    %2 = vector.extract_strided_slice %1 {offsets = [0, 3], sizes = [128, 256], strides = [1, 1]} : vector<128x262xf32> to vector<128x256xf32>
    %cst = arith.constant 0.000000e+00 : f32
    %3 = vector.broadcast %cst : f32 to vector<128x262xf32>
    %4 = arith.cmpf oge, %1, %3 : vector<128x262xf32>
    %cst_2 = arith.constant 2.000000e-01 : f32
    %5 = vector.broadcast %cst_2 : f32 to vector<128x262xf32>
    %6 = arith.mulf %5, %1 : vector<128x262xf32>
    %7 = arith.select %4, %1, %6 : vector<128x262xi1>, vector<128x262xf32>
    %8 = vector.extract_strided_slice %7 {offsets = [0, 0], sizes = [128, 256], strides = [1, 1]} : vector<128x262xf32> to vector<128x256xf32>
    %9 = vector.extract_strided_slice %7 {offsets = [0, 3], sizes = [128, 256], strides = [1, 1]} : vector<128x262xf32> to vector<128x256xf32>
    %10 = vector.extract_strided_slice %7 {offsets = [0, 6], sizes = [128, 256], strides = [1, 1]} : vector<128x262xf32> to vector<128x256xf32>
    %11 = tpu.concatenate %8, %9, %10 in 0 : vector<128x256xf32>, vector<128x256xf32>, vector<128x256xf32> -> vector<384x256xf32>
    %12 = arith.truncf %11 : vector<384x256xf32> to vector<384x256xbf16>
    %c0_3 = arith.constant 0 : index
    %c0_4 = arith.constant 0 : index
    %13 = vector.load %arg2[%c0_3, %c0_4] : memref<128x384xbf16, #tpu.memory_space<vmem>>, vector<128x384xbf16>
    %cst_5 = arith.constant dense<0.000000e+00> : vector<128x256xf32>
    %14 = tpu.matmul %13, %12, %cst_5 {dimension_numbers = #tpu.dot_dimension_numbers<[1], [0], [0], [1], [0, 0, 1, 1], [], []>} : vector<128x384xbf16>, vector<384x256xbf16>, vector<128x256xf32> -> vector<128x256xf32>
    %c0_6 = arith.constant 0 : index
    %c0_7 = arith.constant 0 : index
    %15 = vector.load %arg3[%c0_6, %c0_7] : memref<128x1xf32, #tpu.memory_space<vmem>>, vector<128x1xf32>
    %16 = vector.broadcast %15 : vector<128x1xf32> to vector<128x256xf32>
    %17 = arith.addf %14, %16 : vector<128x256xf32>
    %cst_8 = arith.constant 0.000000e+00 : f32
    %18 = vector.broadcast %cst_8 : f32 to vector<128x256xf32>
    %19 = arith.cmpf oge, %17, %18 : vector<128x256xf32>
    %cst_9 = arith.constant 2.000000e-01 : f32
    %20 = vector.broadcast %cst_9 : f32 to vector<128x256xf32>
    %21 = arith.mulf %20, %17 : vector<128x256xf32>
    %22 = arith.select %19, %17, %21 : vector<128x256xi1>, vector<128x256xf32>
    %c0_10 = arith.constant 0 : index
    %c0_11 = arith.constant 0 : index
    %23 = vector.load %arg4[%c0_10, %c0_11] : memref<128x128xbf16, #tpu.memory_space<vmem>>, vector<128x128xbf16>
    %24 = arith.truncf %22 : vector<128x256xf32> to vector<128x256xbf16>
    %cst_12 = arith.constant dense<0.000000e+00> : vector<128x256xf32>
    %25 = tpu.matmul %23, %24, %cst_12 {dimension_numbers = #tpu.dot_dimension_numbers<[1], [0], [0], [1], [0, 0, 1, 1], [], []>} : vector<128x128xbf16>, vector<128x256xbf16>, vector<128x256xf32> -> vector<128x256xf32>
    %c0_13 = arith.constant 0 : index
    %c0_14 = arith.constant 0 : index
    %26 = vector.load %arg5[%c0_13, %c0_14] : memref<128x1xf32, #tpu.memory_space<vmem>>, vector<128x1xf32>
    %27 = vector.broadcast %26 : vector<128x1xf32> to vector<128x256xf32>
    %28 = arith.addf %25, %27 : vector<128x256xf32>
    %c0_15 = arith.constant 0 : index
    %c0_16 = arith.constant 0 : index
    %29 = vector.load %arg6[%c0_15, %c0_16] : memref<128x128xbf16, #tpu.memory_space<vmem>>, vector<128x128xbf16>
    %30 = arith.truncf %2 : vector<128x256xf32> to vector<128x256xbf16>
    %cst_17 = arith.constant dense<0.000000e+00> : vector<128x256xf32>
    %31 = tpu.matmul %29, %30, %cst_17 {dimension_numbers = #tpu.dot_dimension_numbers<[1], [0], [0], [1], [0, 0, 1, 1], [], []>} : vector<128x128xbf16>, vector<128x256xbf16>, vector<128x256xf32> -> vector<128x256xf32>
    %c0_18 = arith.constant 0 : index
    %c0_19 = arith.constant 0 : index
    %32 = vector.load %arg7[%c0_18, %c0_19] : memref<128x1xf32, #tpu.memory_space<vmem>>, vector<128x1xf32>
    %33 = vector.broadcast %32 : vector<128x1xf32> to vector<128x256xf32>
    %34 = arith.addf %31, %33 : vector<128x256xf32>
    %35 = arith.addf %34, %28 : vector<128x256xf32>
    %c0_20 = arith.constant 0 : index
    %c0_21 = arith.constant 0 : index
    %c0_22 = arith.constant 0 : index
    %36 = vector.load %arg8[%c0_20, %c0_21, %c0_22] : memref<1x128x256xf32, #tpu.memory_space<vmem>>, vector<1x128x256xf32>
    %37 = vector.shape_cast %36 : vector<1x128x256xf32> to vector<128x256xf32>
    %38 = vector.shape_cast %35 : vector<128x256xf32> to vector<1x128x256xf32>
    tpu.vector_store %arg8[%c0_20, %c0_21, %c0_22], %38 {strides = array<i32>} : memref<1x128x256xf32, #tpu.memory_space<vmem>>, vector<1x128x256xf32>,
    return
  }
  func.func @transform_0(%arg0: i32) -> (i32, i32, i32) {
    %c0_i32 = arith.constant 0 : i32
    %c0_i32_0 = arith.constant 0 : i32
    %c0_i32_1 = arith.constant 0 : i32
    return %arg0, %c0_i32, %c0_i32_0 : i32, i32, i32
  }
  func.func @transform_1(%arg0: i32) -> (i32, i32) {
    %c0_i32 = arith.constant 0 : i32
    %c0_i32_0 = arith.constant 0 : i32
    %c0_i32_1 = arith.constant 0 : i32
    return %c0_i32, %c0_i32_0 : i32, i32
  }
  func.func @transform_2(%arg0: i32) -> (i32, i32) {
    %c0_i32 = arith.constant 0 : i32
    %c0_i32_0 = arith.constant 0 : i32
    %c0_i32_1 = arith.constant 0 : i32
    return %c0_i32, %c0_i32_0 : i32, i32
  }
  func.func @transform_3(%arg0: i32) -> (i32, i32) {
    %c0_i32 = arith.constant 0 : i32
    %c0_i32_0 = arith.constant 0 : i32
    %c0_i32_1 = arith.constant 0 : i32
    return %c0_i32, %c0_i32_0 : i32, i32
  }
  func.func @transform_4(%arg0: i32) -> (i32, i32) {
    %c0_i32 = arith.constant 0 : i32
    %c0_i32_0 = arith.constant 0 : i32
    %c0_i32_1 = arith.constant 0 : i32
    return %c0_i32, %c0_i32_0 : i32, i32
  }
  func.func @transform_5(%arg0: i32) -> (i32, i32) {
    %c0_i32 = arith.constant 0 : i32
    %c0_i32_0 = arith.constant 0 : i32
    %c0_i32_1 = arith.constant 0 : i32
    return %c0_i32, %c0_i32_0 : i32, i32
  }
  func.func @transform_6(%arg0: i32) -> (i32, i32) {
    %c0_i32 = arith.constant 0 : i32
    %c0_i32_0 = arith.constant 0 : i32
    %c0_i32_1 = arith.constant 0 : i32
    return %c0_i32, %c0_i32_0 : i32, i32
  }
  func.func @transform_7(%arg0: i32) -> (i32, i32, i32) {
    %c0_i32 = arith.constant 0 : i32
    %c0_i32_0 = arith.constant 0 : i32
    %c0_i32_1 = arith.constant 0 : i32
    return %arg0, %c0_i32, %c0_i32_0 : i32, i32, i32
  }
}

</mosaic_0001>

<bundles_post_ra>
// kernel: resnet_block_pallas.1
= control target key start
LH: loop header
LB: loop body
LE: loop exit
PB: predicated region body
PF: predicated region fallthrough
CT: control target
= control target key end

     0   :  { %12 = vsyncpa [#allocation3], 0  ;;  %s4221_s0 = inlined_call_operand.vmem [shape: f32[2,128,262], index: 0, kind: input, shape index: {}]   ;;  %s4222_s1 = inlined_call_operand.vmem [shape: bf16[128,384], index: 1, kind: input, shape index: {}]   ;;  %s4223_s2 = inlined_call_operand.vmem [shape: f32[128,1], index: 2, kind: input, shape index: {}]   ;;  %s4224_s3 = inlined_call_operand.vmem [shape: bf16[128,128], index: 3, kind: input, shape index: {}]   ;;  %s4225_s4 = inlined_call_operand.vmem [shape: f32[128,1], index: 4, kind: input, shape index: {}]   ;;  %s4226_s5 = inlined_call_operand.vmem [shape: bf16[128,128], index: 5, kind: input, shape index: {}]   ;;  %s4227_s6 = inlined_call_operand.vmem [shape: f32[128,1], index: 6, kind: input, shape index: {}]   ;;  %s4228_s7 = inlined_call_operand.hbm [shape: f32[2,128,256], index: 7, kind: output, shape index: {}]  }
   0x1   :  { %14 = vsyncpa [#allocation3 + $0x1], 0  ;;  %s2954_s24 = smov 0   ;;  %s2956_s25 = smov 0  }
   0x2   :  { %s2958_s26 = smov 0   ;;  %s2960_s27 = smov 0  }
   0x3 LB: > { %s2975_s28 = sadd.s32 4294967295, %s2906_s27   ;;  %s2297_s29 = sadd.s32 4294967294, %s2906_s27   ;;  %s2906_s27 = sphi %s2960_s27, %s4369_s27   ;;  %s2902_s26 = sphi %s2958_s26, %s4368_s26   ;;  %s2898_s25 = sphi %s2956_s25, %s4367_s25   ;;  %s2894_s24 = sphi %s2954_s24, %s4366_s24  }
   0x4   : > { %s2979_s30 = sadd.s32 1, %s2906_s27   ;;  %s179_s8 = sadd.s32 1, %s2902_s26 }
   0x5   : > { %s176_s9 = ssub.s32 %s2906_s27, %s2979_s30  ;;  %p189_p0 = scmp.ne.s32.totalorder %s2902_s26, %s2898_s25 }
   0x6   : > { %p177_p1 = scmp.eq.s32.totalorder %s176_s9, 0  ;;  %p190_p2 = scmp.eq.s32.totalorder %s2975_s28, 1 }
   0x7   : > { %p195_p3 = scmp.ne.s32.totalorder %s2898_s25, %s2894_s24  ;;  %p196_p4 = scmp.eq.s32.totalorder %s2297_s29, 1 }
   0x8   : > { %s2990_s10 = scalar_select %p177_p1, %s2902_s26, %s179_s8  }
   0x9   : > { %p2992_p5 = por %p190_p2, %p189_p0  ;;  %p2996_p6 = por %p196_p4, %p195_p3 }
   0xa   : > { %p2300_p7 = scmp.ge.s32.totalorder %s2906_s27, 1  ;;  %p240_p8 = scmp.lt.s32.totalorder %s2906_s27, 3 }
   0xc   : > { %p241_p9 = pnand %p2300_p7, %p240_p8 }
   0xe   : > { %244 = sbr.rel (%p241_p9) target bundleno = 902 (0x386), region = 48 }
  0x15   : > { %p272_p10 = scmp.lt.s32.totalorder %s2975_s28, 1  ;;  %s2908_s18 = smov 125  }
  0x16   : > { %s2909_s21 = smov 122   ;;  %s269_s16 = sand.u32 1, %s2898_s25  }
  0x17   : > { %s273_s13 = scalar_select %p272_p10, %s2975_s28, 1 }
  0x18   : > { %s2348_s20 = sshll.u32 %s2975_s28, 12  ;;  %s4180_s28 = scalar_lea.sflag [#allocation3], %s269_s16 }
  0x19   : > { %s2509_s14 = smul.u32 384, %s273_s13  ;;  %s4171_s29 = scalar_lea.hbm %s4228_s7, %s2348_s20 }
  0x1a   : > { %s2911_s9 = smov [#allocation2]  }
  0x1b   : > { %s3007_s17 = scalar_lea.vmem %s4221_s0, %s2509_s14  ;;  %s2848_s13 = sshll.u32 %s2911_s9, 4  ;;  %s2849_s13 = int_to_ptr.vmem [resolvable:$false] %s2848_s13 }
  0x1c   : > { %v3010_v0 = vld [vmem:[%s3007_s17 + $0x8] sm:$0xff]  ;;  %v3013_v1 = vld [vmem:[%s3007_s17 + $0x10] sm:$0xff]  ;;  %v3016_v2 = vld [vmem:[%s3007_s17] sm:$0xff]  ;;  %s2850_s14 = scalar_lea.vmem %s2849_s13, 8192 }
  0x1d   : > { %4276 = vst [vmem:[#allocation5_spill] sm:$0xff] %v3010_v0  ;;  %4277 = vst [vmem:[#allocation6_spill] sm:$0xff] %v3013_v1  ;;  %vm327_vm0 = vcmp.ge.f32.partialorder %v3010_v0, 0.0  ;;  %vm328_vm1 = vcmp.ge.f32.partialorder %v3013_v1, 0.0  ;;  %v375_v3 = vmul.f32 0.2, %v3010_v0 }
  0x1e   : > { %4278 = vst [vmem:[#allocation7_spill] sm:$0xff] %v3016_v2  ;;  %v376_v4 = vmul.f32 0.2, %v3013_v1  ;;  %v3023_v5 = vld [vmem:[%s3007_s17 + $0x18] sm:$0xff]  ;;  %vm326_vm2 = vcmp.ge.f32.partialorder %v3016_v2, 0.0  ;;  %v3028_v7 = vld [vmem:[%s3007_s17 + $0x20] sm:$0xff] }
  0x1f   : > { %4279 = vst [vmem:[#allocation8_spill] sm:$0xff] %v3023_v5  ;;  %v374_v6 = vmul.f32 0.2, %v3016_v2  ;;  %4280 = vst [vmem:[#allocation9_spill] sm:$0xff] %v3028_v7  ;;  %v3031_v8 = vld [vmem:[%s3007_s17 + $0x28] sm:$0xff]  ;;  %v3034_v9 = vsel %vm327_vm0, %v3010_v0, %v375_v3  ;;  %vm329_vm3 = vcmp.ge.f32.partialorder %v3023_v5, 0.0 }
  0x20   : > { %4281 = vst [vmem:[#allocation10_spill] sm:$0xff] %v3031_v8  ;;  %v424_v10 = vsel %vm328_vm1, %v3013_v1, %v376_v4  ;;  %v377_v11 = vmul.f32 0.2, %v3023_v5  ;;  %v3040_v12 = vld [vmem:[%s3007_s17 + $0x38] sm:$0xff]  ;;  %v3043_v13 = vld [vmem:[%s3007_s17 + $0x40] sm:$0xff]  ;;  %vm330_vm4 = vcmp.ge.f32.partialorder %v3028_v7, 0.0 }
  0x21   : > { %4282 = vst [vmem:[#allocation11_spill] sm:$0xff] %v3040_v12  ;;  %4283 = vst [vmem:[#allocation12_spill] sm:$0xff] %v3043_v13  ;;  %v3046_v14 = vpack.i.bf16 %v424_v10, %v3034_v9  ;;  %v3049_v15 = vsel %vm326_vm2, %v3016_v2, %v374_v6  ;;  %v3053_v16 = vld [vmem:[%s3007_s17 + $0x50] sm:$0xff]  ;;  %vm331_vm5 = vcmp.ge.f32.partialorder %v3031_v8, 0.0  ;;  %v378_v18 = vmul.f32 0.2, %v3028_v7 }
  0x22   : > { %4284 = vst [vmem:[#allocation13_spill] sm:$0xff] %v3053_v16  ;;  %v3056_v17 = vsel %vm329_vm3, %v3023_v5, %v377_v11  ;;  %v379_v19 = vmul.f32 0.2, %v3031_v8  ;;  %v3062_v20 = vld [vmem:[%s3007_s17 + $0x58] sm:$0xff]  ;;  %vm333_vm6 = vcmp.ge.f32.partialorder %v3040_v12, 0.0  ;;  %vm334_vm7 = vcmp.ge.f32.partialorder %v3043_v13, 0.0 }
  0x23   : > { %4285 = vst [vmem:[#allocation14_spill] sm:$0xff] %v3062_v20  ;;  %2555 = vrot.lane.b32.xlu0 %v3046_v14, %s2908_s18  ;;  %v3068_v21 = vpack.i.bf16 %v3056_v17, %v3049_v15  ;;  %v381_v22 = vmul.f32 0.2, %v3040_v12  ;;  %v3074_v23 = vld [vmem:[%s3007_s17 + $0x30] sm:$0xff]  ;;  %v3077_v24 = vld [vmem:[%s3007_s17 + $0x48] sm:$0xff]  ;;  %v3080_v25 = vsel %vm330_vm4, %v3028_v7, %v378_v18  ;;  %vm336_vm8 = vcmp.ge.f32.partialorder %v3053_v16, 0.0 }
  0x24   : > { %4286 = vst [vmem:[#allocation15_spill] sm:$0xff] %v3074_v23  ;;  %4287 = vst [vmem:[#allocation16_spill] sm:$0xff] %v3077_v24  ;;  %v427_v26 = vsel %vm331_vm5, %v3031_v8, %v379_v19  ;;  %v382_v27 = vmul.f32 0.2, %v3043_v13  ;;  %vm337_vm9 = vcmp.ge.f32.partialorder %v3062_v20, 0.0  ;;  %v3096_v31 = vld [vmem:[%s3007_s17 + $0x68] sm:$0xff] }
  0x25   : > { %2565 = vrot.lane.b32.xlu1 %v3068_v21, %s2908_s18  ;;  %v3088_v28 = vpack.i.bf16 %v427_v26, %v3080_v25  ;;  %v3091_v29 = vsel %vm333_vm6, %v3040_v12, %v381_v22  ;;  %v384_v30 = vmul.f32 0.2, %v3053_v16  ;;  %4288 = vst [vmem:[#allocation17_spill] sm:$0xff] %v3096_v31  ;;  %v3099_v32 = vld [vmem:[%s3007_s17 + $0x70] sm:$0xff]  ;;  %v385_v34 = vmul.f32 0.2, %v3062_v20 }
  0x26   : > { %4289 = vst [vmem:[#allocation18_spill] sm:$0xff] %v3099_v32  ;;  %v430_v33 = vsel %vm334_vm7, %v3043_v13, %v382_v27  ;;  %vm332_vm10 = vcmp.ge.f32.partialorder %v3074_v23, 0.0  ;;  %vm335_vm11 = vcmp.ge.f32.partialorder %v3077_v24, 0.0  ;;  %v380_v37 = vmul.f32 0.2, %v3074_v23  ;;  %v3116_v39 = vld [vmem:[%s3007_s17 + $0x80] sm:$0xff] }
  0x27   : > { %2560 = vrot.lane.b32.xlu0 %v3088_v28, %s2908_s18  ;;  %v3108_v35 = vpack.i.bf16 %v430_v33, %v3091_v29  ;;  %v3111_v36 = vsel %vm336_vm8, %v3053_v16, %v384_v30  ;;  %v383_v38 = vmul.f32 0.2, %v3077_v24  ;;  %4290 = vst [vmem:[#allocation19_spill] sm:$0xff] %v3116_v39  ;;  %v3119_v40 = vld [vmem:[%s3007_s17 + $0x88] sm:$0xff]  ;;  %v433_v41 = vsel %vm337_vm9, %v3062_v20, %v385_v34  ;;  %v3126_v43 = vld [vmem:[%s3007_s17 + $0x60] sm:$0xff]  ;;  %v3145_v48 = vld [vmem:[%s3007_s17 + $0x78] sm:$0xff] }
  0x28   : > { %4291 = vst [vmem:[#allocation20_spill] sm:$0xff] %v3119_v40  ;;  %vm339_vm12 = vcmp.ge.f32.partialorder %v3096_v31, 0.0  ;;  %vm340_vm13 = vcmp.ge.f32.partialorder %v3099_v32, 0.0  ;;  %v387_v42 = vmul.f32 0.2, %v3096_v31  ;;  %4292 = vst [vmem:[#allocation21_spill] sm:$0xff] %v3126_v43  ;;  %v3131_v44 = vpack.i.bf16 %v433_v41, %v3111_v36 }
  0x29   : > { %2570 = vrot.lane.b32.xlu1 %v3108_v35, %s2908_s18  ;;  %v3136_v45 = vsel %vm332_vm10, %v3074_v23, %v380_v37  ;;  %v3141_v46 = vsel %vm335_vm11, %v3077_v24, %v383_v38  ;;  %v388_v47 = vmul.f32 0.2, %v3099_v32  ;;  %4293 = vst [vmem:[#allocation22_spill] sm:$0xff] %v3145_v48  ;;  %vm342_vm14 = vcmp.ge.f32.partialorder %v3116_v39, 0.0  ;;  %v3157_v51 = vld [vmem:[%s3007_s17 + $0x98] sm:$0xff]  ;;  %v3160_v52 = vld [vmem:[%s3007_s17 + $0xa0] sm:$0xff] }
  0x2a   : > { %v3149_v49 = vpack.i.bf16 %v3141_v46, %v3136_v45  ;;  %v3152_v50 = vsel %vm339_vm12, %v3096_v31, %v387_v42  ;;  %vm343_vm15 = vcmp.ge.f32.partialorder %v3119_v40, 0.0  ;;  %4294 = vst [vmem:[#allocation23_spill] sm:$0xff] %v3157_v51  ;;  %4295 = vst [vmem:[#allocation24_spill] sm:$0xff] %v3160_v52  ;;  %v390_v54 = vmul.f32 0.2, %v3116_v39  ;;  %v3171_v56 = vld [vmem:[%s3007_s17 + $0xb0] sm:$0xff] }
  0x2b   : > { %2575 = vrot.lane.b32.xlu0 %v3131_v44, %s2908_s18  ;;  %v436_v53 = vsel %vm340_vm13, %v3099_v32, %v388_v47  ;;  %v391_v55 = vmul.f32 0.2, %v3119_v40  ;;  %vm338_vm0 = vcmp.ge.f32.partialorder %v3126_v43, 0.0  ;;  %4296 = vst [vmem:[#allocation25_spill] sm:$0xff] %v3171_v56  ;;  %vm341_vm1 = vcmp.ge.f32.partialorder %v3145_v48, 0.0  ;;  %v3180_v60 = vld [vmem:[%s3007_s17 + $0xb8] sm:$0xff] }
  0x2c   : > { %v3174_v57 = vpack.i.bf16 %v436_v53, %v3152_v50  ;;  %v386_v58 = vmul.f32 0.2, %v3126_v43  ;;  %v389_v59 = vmul.f32 0.2, %v3145_v48  ;;  %4297 = vst [vmem:[#allocation26_spill] sm:$0xff] %v3180_v60  ;;  %v3187_v61 = vsel %vm342_vm14, %v3116_v39, %v390_v54  ;;  %v3195_v63 = vld [vmem:[%s3007_s17 + $0x90] sm:$0xff] }
  0x2d   : > { %2580 = vrot.lane.b32.xlu1 %v3149_v49, %s2908_s18  ;;  %v439_v62 = vsel %vm343_vm15, %v3119_v40, %v391_v55  ;;  %vm345_vm2 = vcmp.ge.f32.partialorder %v3157_v51, 0.0  ;;  %vm346_vm3 = vcmp.ge.f32.partialorder %v3160_v52, 0.0  ;;  %4298 = vst [vmem:[#allocation27_spill] sm:$0xff] %v3195_v63  ;;  %v393_v10 = vmul.f32 0.2, %v3157_v51  ;;  %v3208_v11 = vld [vmem:[%s3007_s17 + $0xa8] sm:$0xff] }
  0x2e   : > { %v3198_v3 = vpack.i.bf16 %v439_v62, %v3187_v61  ;;  %v3201_v4 = vsel %vm338_vm0, %v3126_v43, %v386_v58  ;;  %v3204_v6 = vsel %vm341_vm1, %v3145_v48, %v389_v59  ;;  %4299 = vst [vmem:[#allocation28_spill] sm:$0xff] %v3208_v11  ;;  %v394_v19 = vmul.f32 0.2, %v3160_v52  ;;  %v3220_v22 = vld [vmem:[%s3007_s17 + $0xc8] sm:$0xff]  ;;  %v3229_v33 = vld [vmem:[%s3007_s17 + $0xd0] sm:$0xff]  ;;  %v3240_v41 = vld [vmem:[%s3007_s17 + $0xe0] sm:$0xff] }
  0x2f   : > { %2585 = vrot.lane.b32.xlu0 %v3174_v57, %s2908_s18  ;;  %v3214_v18 = vpack.i.bf16 %v3204_v6, %v3201_v4  ;;  %vm348_vm4 = vcmp.ge.f32.partialorder %v3171_v56, 0.0  ;;  %vm349_vm5 = vcmp.ge.f32.partialorder %v3180_v60, 0.0  ;;  %4300 = vst [vmem:[#allocation29_spill] sm:$0xff] %v3220_v22  ;;  %v3223_v26 = vsel %vm345_vm2, %v3157_v51, %v393_v10  ;;  %4301 = vst [vmem:[#allocation30_spill] sm:$0xff] %v3229_v33  ;;  %v3251_v54 = vld [vmem:[%s3007_s17 + $0xe8] sm:$0xff]  ;;  %v3254_v55 = vld [vmem:[%s3007_s17 + $0xc0] sm:$0xff] }
  0x30   : > { %v396_v27 = vmul.f32 0.2, %v3171_v56  ;;  %v397_v30 = vmul.f32 0.2, %v3180_v60  ;;  %vm344_vm6 = vcmp.ge.f32.partialorder %v3195_v63, 0.0  ;;  %v442_v34 = vsel %vm346_vm3, %v3160_v52, %v394_v19  ;;  %4302 = vst [vmem:[#allocation31_spill] sm:$0xff] %v3240_v41 }
  0x31   : > { %2590 = vrot.lane.b32.xlu1 %v3198_v3, %s2908_s18  ;;  %vm347_vm7 = vcmp.ge.f32.partialorder %v3208_v11, 0.0  ;;  %v392_v37 = vmul.f32 0.2, %v3195_v63  ;;  %v395_v38 = vmul.f32 0.2, %v3208_v11  ;;  %v3243_v42 = vpack.i.bf16 %v442_v34, %v3223_v26  ;;  %4303 = vst [vmem:[#allocation32_spill] sm:$0xff] %v3251_v54 }
  0x32   : > { %v3246_v47 = vsel %vm348_vm4, %v3171_v56, %v396_v27  ;;  %v445_v53 = vsel %vm349_vm5, %v3180_v60, %v397_v30  ;;  %vm351_vm8 = vcmp.ge.f32.partialorder %v3220_v22, 0.0  ;;  %4304 = vst [vmem:[#allocation33_spill] sm:$0xff] %v3254_v55  ;;  %v3257_v58 = vld [vmem:[%s3007_s17 + $0xd8] sm:$0xff]  ;;  %vm352_vm9 = vcmp.ge.f32.partialorder %v3229_v33, 0.0  ;;  %v3277_v27 = vld [vmem:[%s3007_s17 + $0x100] sm:$0xff]  ;;  %v3307_v43 = vld [vmem:[%s3007_s17 + $0xf0] sm:$0xff] }
  0x33   : > { %4305 = vst [vmem:[#allocation34_spill] sm:$0xff] %v3257_v58  ;;  %2595 = vrot.lane.b32.xlu0 %v3214_v18, %s2908_s18  ;;  %v3262_v59 = vpack.i.bf16 %v445_v53, %v3246_v47  ;;  %v3267_v62 = vsel %vm344_vm6, %v3195_v63, %v392_v37  ;;  %v3270_v10 = vsel %vm347_vm7, %v3208_v11, %v395_v38  ;;  %v3274_v19 = vld [vmem:[%s3007_s17 + $0xf8] sm:$0xff]  ;;  %4307 = vst [vmem:[#allocation36_spill] sm:$0xff] %v3277_v27  ;;  %v3287_v38 = vld [vmem:[%s3007_s17 + $0x110] sm:$0xff] }
  0x34   : > { %4306 = vst [vmem:[#allocation35_spill] sm:$0xff] %v3274_v19  ;;  %v3281_v30 = vpack.i.bf16 %v3270_v10, %v3267_v62  ;;  %v399_v34 = vmul.f32 0.2, %v3220_v22  ;;  %v400_v37 = vmul.f32 0.2, %v3229_v33  ;;  %vm354_vm10 = vcmp.ge.f32.partialorder %v3240_v41, 0.0 }
  0x35   : > { %4308 = vst [vmem:[#allocation37_spill] sm:$0xff] %v3287_v38  ;;  %2600 = vrot.lane.b32.xlu1 %v3243_v42, %s2908_s18  ;;  %vm355_vm11 = vcmp.ge.f32.partialorder %v3251_v54, 0.0  ;;  %v402_v53 = vmul.f32 0.2, %v3240_v41  ;;  %v403_v60 = vmul.f32 0.2, %v3251_v54 }
  0x36   : > { %vm350_vm12 = vcmp.ge.f32.partialorder %v3254_v55, 0.0  ;;  %v3296_v52 = vld [vmem:[%s3007_s17 + $0x118] sm:$0xff]  ;;  %v3301_v11 = vsel %vm351_vm8, %v3220_v22, %v399_v34  ;;  %v448_v63 = vsel %vm352_vm9, %v3229_v33, %v400_v37  ;;  %vm353_vm13 = vcmp.ge.f32.partialorder %v3257_v58, 0.0  ;;  %4310 = vst [vmem:[#allocation39_spill] sm:$0xff] %v3307_v43  ;;  %v3310_v56 = vld [vmem:[%s3007_s17 + $0x108] sm:$0xff]  ;;  %v3336_v31 = vld [vmem:[%s3007_s17 + $0x130] sm:$0xff] }
  0x37   : > { %4309 = vst [vmem:[#allocation38_spill] sm:$0xff] %v3296_v52  ;;  %v398_v48 = vmul.f32 0.2, %v3254_v55  ;;  %4311 = vst [vmem:[#allocation40_spill] sm:$0xff] %v3310_v56  ;;  %2605 = vrot.lane.b32.xlu0 %v3262_v59, %s2908_s18  ;;  %v3315_v51 = vpack.i.bf16 %v448_v63, %v3301_v11  ;;  %v3320_v34 = vsel %vm354_vm10, %v3240_v41, %v402_v53  ;;  %v401_v22 = vmul.f32 0.2, %v3257_v58 }
  0x38   : > { %v451_v37 = vsel %vm355_vm11, %v3251_v54, %v403_v60  ;;  %vm357_vm14 = vcmp.ge.f32.partialorder %v3274_v19, 0.0  ;;  %vm358_vm15 = vcmp.ge.f32.partialorder %v3277_v27, 0.0  ;;  %v3333_v63 = vld [vmem:[%s3007_s17 + $0x128] sm:$0xff]  ;;  %4313 = vst [vmem:[#allocation42_spill] sm:$0xff] %v3336_v31  ;;  %v405_v53 = vmul.f32 0.2, %v3274_v19 }
  0x39   : > { %v3325_v33 = vpack.i.bf16 %v451_v37, %v3320_v34  ;;  %v3328_v39 = vsel %vm350_vm12, %v3254_v55, %v398_v48  ;;  %4312 = vst [vmem:[#allocation41_spill] sm:$0xff] %v3333_v63  ;;  %2610 = vrot.lane.b32.xlu1 %v3281_v30, %s2908_s18  ;;  %v3343_v60 = vsel %vm353_vm13, %v3257_v58, %v401_v22  ;;  %v406_v48 = vmul.f32 0.2, %v3277_v27  ;;  %v3349_v37 = vld [vmem:[%s3007_s17 + $0x140] sm:$0xff]  ;;  %v3359_v58 = vld [vmem:[%s3007_s17 + $0x148] sm:$0xff]  ;;  %v3385_v24 = vld [vmem:[%s3007_s17 + $0x138] sm:$0xff] }
  0x3a   : > { %vm360_vm0 = vcmp.ge.f32.partialorder %v3287_v38, 0.0  ;;  %4314 = vst [vmem:[#allocation43_spill] sm:$0xff] %v3349_v37  ;;  %v3353_v55 = vpack.i.bf16 %v3343_v60, %v3328_v39  ;;  %vm361_vm1 = vcmp.ge.f32.partialorder %v3296_v52, 0.0  ;;  %v408_v41 = vmul.f32 0.2, %v3287_v38  ;;  %4315 = vst [vmem:[#allocation44_spill] sm:$0xff] %v3359_v58 }
  0x3b   : > { %v409_v22 = vmul.f32 0.2, %v3296_v52  ;;  %2615 = vrot.lane.b32.xlu0 %v3315_v51, %s2908_s18  ;;  %v3366_v54 = vsel %vm357_vm14, %v3274_v19, %v405_v53  ;;  %v454_v40 = vsel %vm358_vm15, %v3277_v27, %v406_v48  ;;  %vm356_vm2 = vcmp.ge.f32.partialorder %v3307_v43, 0.0  ;;  %v3382_v19 = vld [vmem:[%s3007_s17 + $0x120] sm:$0xff]  ;;  %4317 = vst [vmem:[#allocation46_spill] sm:$0xff] %v3385_v24  ;;  %v3418_v23 = vld [vmem:[%s3007_s17 + $0x170] sm:$0xff] }
  0x3c   : > { %vm359_vm3 = vcmp.ge.f32.partialorder %v3310_v56, 0.0  ;;  %v3374_v32 = vpack.i.bf16 %v454_v40, %v3366_v54  ;;  %v3377_v20 = vsel %vm360_vm0, %v3287_v38, %v408_v41  ;;  %v404_v53 = vmul.f32 0.2, %v3307_v43  ;;  %4316 = vst [vmem:[#allocation45_spill] sm:$0xff] %v3382_v19  ;;  %v3396_v41 = vld [vmem:[%s3007_s17 + $0x158] sm:$0xff]  ;;  %v3442_v7 = vld [vmem:[%s3007_s17 + $0x150] sm:$0xff] }
  0x3d   : > { %v457_v13 = vsel %vm361_vm1, %v3296_v52, %v409_v22  ;;  %2620 = vrot.lane.b32.xlu1 %v3325_v33, %s2908_s18  ;;  %v407_v40 = vmul.f32 0.2, %v3310_v56  ;;  %vm363_vm4 = vcmp.ge.f32.partialorder %v3333_v63, 0.0  ;;  %vm364_vm5 = vcmp.ge.f32.partialorder %v3336_v31, 0.0  ;;  %4318 = vst [vmem:[#allocation47_spill] sm:$0xff] %v3396_v41 }
  0x3e   : > { %v3390_v48 = vpack.i.bf16 %v457_v13, %v3377_v20  ;;  %v3399_v22 = vsel %vm356_vm2, %v3307_v43, %v404_v53  ;;  %v411_v52 = vmul.f32 0.2, %v3333_v63  ;;  %v412_v27 = vmul.f32 0.2, %v3336_v31  ;;  %v3405_v13 = vld [vmem:[%s3007_s17 + $0x160] sm:$0xff] }
  0x3f   : > { %vm366_vm6 = vcmp.ge.f32.partialorder %v3349_v37, 0.0  ;;  %4319 = vst [vmem:[#allocation48_spill] sm:$0xff] %v3405_v13  ;;  %2625 = vrot.lane.b32.xlu0 %v3353_v55, %s2908_s18  ;;  %v3412_v38 = vsel %vm359_vm3, %v3310_v56, %v407_v40  ;;  %vm367_vm7 = vcmp.ge.f32.partialorder %v3359_v58, 0.0  ;;  %v414_v53 = vmul.f32 0.2, %v3349_v37  ;;  %v3429_v40 = vld [vmem:[%s3007_s17 + $0x178] sm:$0xff] }
  0x40   : > { %v415_v43 = vmul.f32 0.2, %v3359_v58  ;;  %v3422_v5 = vpack.i.bf16 %v3412_v38, %v3399_v22  ;;  %v3425_v2 = vsel %vm363_vm4, %v3333_v63, %v411_v52  ;;  %v460_v16 = vsel %vm364_vm5, %v3336_v31, %v412_v27  ;;  %v3449_v31 = vld [vmem:[%s3007_s17 + $0x168] sm:$0xff]  ;;  %s2301_s17 = sshll.u32 %s269_s16, 8 }
  0x41   : > { %2630 = vrot.lane.b32.xlu1 %v3374_v32, %s2908_s18  ;;  %v3434_v56 = vpack.i.bf16 %v460_v16, %v3425_v2  ;;  %v3437_v12 = vsel %vm366_vm6, %v3349_v37, %v414_v53  ;;  %vm362_vm8 = vcmp.ge.f32.partialorder %v3382_v19, 0.0  ;;  %vm365_vm9 = vcmp.ge.f32.partialorder %v3385_v24, 0.0  ;;  %s4126_s19 = scalar_lea.vmem [#allocation2], %s2301_s17 }
  0x42   : > { %v463_v52 = vsel %vm367_vm7, %v3359_v58, %v415_v43  ;;  %v410_v27 = vmul.f32 0.2, %v3382_v19  ;;  %v413_v63 = vmul.f32 0.2, %v3385_v24  ;;  %vm369_vm10 = vcmp.ge.f32.partialorder %v3396_v41, 0.0 }
  0x43   : > { %4320 = vst [vmem:[#allocation49_spill] sm:$0xff] %v3434_v56  ;;  %2635 = vrot.lane.b32.xlu0 %v3390_v48, %s2908_s18  ;;  %vm370_vm11 = vcmp.ge.f32.partialorder %v3405_v13, 0.0  ;;  %v417_v16 = vmul.f32 0.2, %v3396_v41  ;;  %v418_v53 = vmul.f32 0.2, %v3405_v13  ;;  %v3468_v0 = vpack.i.bf16 %v463_v52, %v3437_v12 }
  0x44   : > { %vm372_vm12 = vcmp.ge.f32.partialorder %v3418_v23, 0.0  ;;  %v3458_v43 = vsel %vm362_vm8, %v3382_v19, %v410_v27  ;;  %v3461_v37 = vsel %vm365_vm9, %v3385_v24, %v413_v63  ;;  %vm373_vm13 = vcmp.ge.f32.partialorder %v3429_v40, 0.0 }
  0x45   : > { %v420_v58 = vmul.f32 0.2, %v3418_v23  ;;  %2640 = vrot.lane.b32.xlu1 %v3422_v5, %s2908_s18  ;;  %v421_v8 = vmul.f32 0.2, %v3429_v40  ;;  %v3472_v1 = vsel %vm369_vm10, %v3396_v41, %v417_v16  ;;  %v466_v27 = vsel %vm370_vm11, %v3405_v13, %v418_v53 }
  0x46   : > { %vm368_vm14 = vcmp.ge.f32.partialorder %v3442_v7, 0.0  ;;  %vm371_vm15 = vcmp.ge.f32.partialorder %v3449_v31, 0.0  ;;  %v3481_v63 = vpack.i.bf16 %v3461_v37, %v3458_v43  ;;  %v416_v52 = vmul.f32 0.2, %v3442_v7 }
  0x47   : > { %2645 = vrot.lane.b32.xlu0 %v3434_v56, %s2908_s18  ;;  %v419_v24 = vmul.f32 0.2, %v3449_v31  ;;  %v468_v16 = vsel %vm372_vm12, %v3418_v23, %v420_v58  ;;  %v469_v53 = vsel %vm373_vm13, %v3429_v40, %v421_v8  ;;  %v3492_v13 = vpack.i.bf16 %v466_v27, %v3472_v1  ;;  %v2798_v56 = vld [vmem:[%s4222_s1 + $0x4] ss:$12 sps:$4 sm:$0xff]  }
  0x48   : > { %v464_v19 = vsel %vm368_vm14, %v3442_v7, %v416_v52  ;;  %v3501_v58 = vpack.i.bf16 %v469_v53, %v468_v16  ;;  %1176 = vmatprep.mubr.bf16.mxu0 %v2798_v56  ;;  %v841_v27 = vpack.c.bf16 %v3080_v25, %v3034_v9  ;;  %v843_v52 = vpack.c.bf16 %v3111_v36, %v3091_v29  ;;  %v4323_v53 = vld [vmem:[#allocation10_spill] sm:$0xff] }
  0x49   : > { %2650 = vrot.lane.b32.xlu1 %v3468_v0, %s2908_s18  ;;  %v467_v41 = vsel %vm371_vm15, %v3449_v31, %v419_v24  ;;  %v840_v24 = vpack.c.bf16 %v3056_v17, %v3049_v15  ;;  %v842_v56 = vpack.c.bf16 %v3141_v46, %v3136_v45  ;;  %v845_v9 = vpack.c.bf16 %v3187_v61, %v3152_v50  ;;  %v924_v45 = vld [vmem:[%s4223_s2 + $0x20] sm:$0xff]  ;;  %v927_v46 = vld [vmem:[%s4223_s2 + $0x38] sm:$0xff]  ;;  %v929_v50 = vld [vmem:[%s4223_s2 + $0x48] sm:$0xff] }
  0x4a   : > { %v3505_v8 = vpack.i.bf16 %v467_v41, %v464_v19  ;;  %1144 = vmatprep.subr.bf16.mxu0 %v841_v27  ;;  %v844_v15 = vpack.c.bf16 %v3204_v6, %v3201_v4  ;;  %v847_v17 = vpack.c.bf16 %v3246_v47, %v3223_v26  ;;  %v846_v25 = vpack.c.bf16 %v3270_v10, %v3267_v62  ;;  %v933_v26 = vld [vmem:[%s4223_s2 + $0x68] sm:$0xff] }
  0x4b   : > { %2655 = vrot.lane.b32.xlu0 %v3481_v63, %s2908_s18  ;;  %1145 = vmatpush1.bf16.msra.mxu0 %v840_v24  ;;  %v850_v29 = vpack.c.bf16 %v3412_v38, %v3399_v22  ;;  %v855_v36 = vpack.c.bf16 %v468_v16, %v3472_v1  ;;  %v2910_v1 = vmov 0   ;;  %vm614_vm0 = vcmask 1022976   ;;  %v4322_v16 = vld [vmem:[#allocation6_spill] sm:$0xff] }
  0x4c   : > { %1146 = vmatprep.subr.bf16.mxu0 %v843_v52  ;;  %2795 = vset.pattern.permute.xlu1 %v2910_v1  ;;  %vm775_vm1 = vcmask 998400  }
  0x4d   : > { %2660 = vrot.lane.b32.xlu1 %v3492_v13, %s2908_s18  ;;  %2794 = vset.pattern.permute.xlu0 %v2910_v1 }
  0x4e   : > { %1674 = vmatprep.mubr.bf16.mxu1 %v2910_v1 }
  0x4f   : > { %2665 = vrot.lane.b32.xlu0 %v3501_v58, %s2908_s18  ;;  %1147 = vmatpush1.bf16.msra.mxu0 %v842_v56 }
  0x50   : > { %1148 = vmatprep.subr.bf16.mxu0 %v845_v9 }
  0x51   : > { %2670 = vrot.lane.b32.xlu1 %v3505_v8, %s2908_s18 }
  0x53   : > { %2675 = vrot.lane.b32.xlu0 %v3046_v14, %s2909_s21  ;;  %1149 = vmatpush1.bf16.msra.mxu0 %v844_v15  ;;  %v849_v14 = vpack.c.bf16 %v3320_v34, %v3301_v11  ;;  %v4324_v15 = vld [vmem:[#allocation5_spill] sm:$0xff] }
  0x54   : > { %1150 = vmatprep.subr.bf16.mxu0 %v847_v17  ;;  %v4325_v17 = vld [vmem:[#allocation9_spill] sm:$0xff] }
  0x55   : > { %2680 = vrot.lane.b32.xlu1 %v3088_v28, %s2909_s21  ;;  %v848_v28 = vpack.c.bf16 %v3343_v60, %v3328_v39  ;;  %v854_v39 = vpack.c.bf16 %v467_v41, %v464_v19  ;;  %v935_v60 = vld [vmem:[%s4223_s2 + $0x78] sm:$0xff] }
  0x57   : > { %2685 = vrot.lane.b32.xlu0 %v3068_v21, %s2909_s21  ;;  %1151 = vmatpush1.bf16.msra.mxu0 %v846_v25  ;;  %v851_v21 = vpack.c.bf16 %v3377_v20, %v3366_v54  ;;  %v852_v20 = vpack.c.bf16 %v3461_v37, %v3458_v43  ;;  %v934_v43 = vld [vmem:[%s4223_s2 + $0x70] sm:$0xff]  ;;  %v1772_v25 = vpack.c.bf16 %v4325_v17, %v4324_v15 }
  0x58   : > { %1152 = vmatprep.subr.bf16.mxu0 %v849_v14 }
  0x59   : > { %2690 = vrot.lane.b32.xlu1 %v3108_v35, %s2909_s21  ;;  %v853_v35 = vpack.c.bf16 %v3437_v12, %v3425_v2  ;;  %v4321_v2 = vld [vmem:[#allocation49_spill] sm:$0xff] }
  0x5a   : > { %v920_v12 = vld [vmem:[%s4223_s2] sm:$0xff] }
  0x5b   : > { %2695 = vrot.lane.b32.xlu0 %v3131_v44, %s2909_s21  ;;  %1153 = vmatpush1.bf16.msra.mxu0 %v848_v28  ;;  %v925_v44 = vld [vmem:[%s4223_s2 + $0x28] sm:$0xff] }
  0x5c   : > { %1154 = vmatprep.subr.bf16.mxu0 %v851_v21 }
  0x5d   : > { %2700 = vrot.lane.b32.xlu1 %v3149_v49, %s2909_s21  ;;  %v926_v49 = vld [vmem:[%s4223_s2 + $0x30] sm:$0xff] }
  0x5f   : > { %2705 = vrot.lane.b32.xlu0 %v3174_v57, %s2909_s21  ;;  %1155 = vmatpush1.bf16.msra.mxu0 %v850_v29  ;;  %v931_v57 = vld [vmem:[%s4223_s2 + $0x58] sm:$0xff] }
  0x60   : > { %1156 = vmatprep.subr.bf16.mxu0 %v853_v35 }
  0x61   : > { %2710 = vrot.lane.b32.xlu1 %v3198_v3, %s2909_s21  ;;  %v930_v3 = vld [vmem:[%s4223_s2 + $0x50] sm:$0xff] }
  0x63   : > { %2715 = vrot.lane.b32.xlu0 %v3214_v18, %s2909_s21  ;;  %1157 = vmatpush1.bf16.msra.mxu0 %v852_v20 }
  0x64   : > { %1158 = vmatprep.subr.bf16.mxu0 %v855_v36  ;;  %v4326_v36 = vld [vmem:[#allocation11_spill] sm:$0xff] }
  0x65   : > { %2720 = vrot.lane.b32.xlu1 %v3243_v42, %s2909_s21 }
  0x67   : > { %2725 = vrot.lane.b32.xlu0 %v3262_v59, %s2909_s21  ;;  %1159 = vmatpush1.bf16.msra.mxu0 %v854_v39  ;;  %v4327_v39 = vld [vmem:[#allocation13_spill] sm:$0xff] }
  0x69   : > { %2730 = vrot.lane.b32.xlu1 %v3281_v30, %s2909_s21 }
  0x6b   : > { %2735 = vrot.lane.b32.xlu0 %v3315_v51, %s2909_s21  ;;  %v928_v51 = vld [vmem:[%s4223_s2 + $0x40] sm:$0xff] }
  0x6d   : > { %2740 = vrot.lane.b32.xlu1 %v3325_v33, %s2909_s21 }
  0x6f   : > { %2745 = vrot.lane.b32.xlu0 %v3353_v55, %s2909_s21  ;;  %v932_v55 = vld [vmem:[%s4223_s2 + $0x60] sm:$0xff] }
  0x71   : > { %2750 = vrot.lane.b32.xlu1 %v3374_v32, %s2909_s21  ;;  %v922_v32 = vld [vmem:[%s4223_s2 + $0x10] sm:$0xff] }
  0x73   : > { %2755 = vrot.lane.b32.xlu0 %v3390_v48, %s2909_s21 }
  0x75   : > { %2760 = vrot.lane.b32.xlu1 %v3422_v5, %s2909_s21  ;;  %v923_v5 = vld [vmem:[%s4223_s2 + $0x18] sm:$0xff] }
  0x77   : > { %2765 = vrot.lane.b32.xlu0 %v4321_v2, %s2909_s21  ;;  %v1775_v2 = vpack.c.bf16 %v4327_v39, %v4326_v36 }
  0x79   : > { %2770 = vrot.lane.b32.xlu1 %v3468_v0, %s2909_s21  ;;  %v921_v0 = vld [vmem:[%s4223_s2 + $0x8] sm:$0xff] }
  0x7b   : > { %2775 = vrot.lane.b32.xlu0 %v3481_v63, %s2909_s21 }
  0x7d   : > { %2780 = vrot.lane.b32.xlu1 %v3492_v13, %s2909_s21 }
  0x7f   : > { %2785 = vrot.lane.b32.xlu0 %v3501_v58, %s2909_s21  ;;  %v1773_v58 = vpack.c.bf16 %v4323_v53, %v4322_v16 }
  0x81   : > { %2790 = vrot.lane.b32.xlu1 %v3505_v8, %s2909_s21  ;;  %s2235_s21 = sshll.u32 %s4126_s19, 4  ;;  %s4173_s21 = int_to_ptr.vmem [resolvable:$true] %s2235_s21 }
  0x82   : > { %s2844_s8 = scalar_lea.vmem %s4173_s21, 4096  ;;  %p2851_p0 = scmp.lt.s32.totalorder %s4173_s21, %s2849_s13 }
  0x83   : > { %938 = vperm.xlu0 %2794, %v920_v12   ;;  %p2845_p11 = scmp.ne.s32.totalorder %s4173_s21, %s2844_s8  ;;  %p2852_p1 = scmp.lt.s32.totalorder %s2850_s14, %s2844_s8 }
  0x85   : > { %943 = vperm.xlu1 %2795, %v921_v0   ;;  %p2846_p12 = pnand %p2845_p11, %p2992_p5  ;;  %p2853_p2 = por %p2852_p1, %p2851_p0 }
  0x87   : > { %953 = vperm.xlu0 %2794, %v923_v5   ;;  %p2847_p13 = pneg %p2846_p12 }
  0x89   : > { %948 = vperm.xlu1 %2795, %v922_v32   ;;  %p2854_p3 = pnand %p2853_p2, %p2847_p13 }
  0x8b   : > { %963 = vperm.xlu0 %2794, %v925_v44   ;;  %v4328_v44 = vld [vmem:[#allocation7_spill] sm:$0xff] }
  0x8d   : > { %958 = vperm.xlu1 %2795, %v924_v45   ;;  %v4329_v45 = vld [vmem:[#allocation8_spill] sm:$0xff] }
  0x8f   : > { %973 = vperm.xlu0 %2794, %v927_v46   ;;  %v1771_v46 = vpack.c.bf16 %v4329_v45, %v4328_v44 }
  0x91   : > { %968 = vperm.xlu1 %2795, %v926_v49  }
  0x93   : > { %983 = vperm.xlu0 %2794, %v929_v50  }
  0x95   : > { %v2556_v61 = vpop.permute.xlu0 %2555  ;;  %978 = vperm.xlu1 %2795, %v928_v51  }
  0x96   : > { %v2558_v4 = vunpack.i.h.bf16 %v2556_v61  ;;  %v2557_v6 = vunpack.i.l.bf16 %v2556_v61 }
  0x97   : > { %v2566_v11 = vpop.permute.xlu1 %2565  ;;  %993 = vperm.xlu0 %2794, %v931_v57  }
  0x98   : > { %v2567_v18 = vunpack.i.l.bf16 %v2566_v11  ;;  %v2568_v42 = vunpack.i.h.bf16 %v2566_v11  ;;  %v616_v62 = vsel %vm614_vm0, %v2557_v6, %v2558_v4  ;;  %v4331_v4 = vld [vmem:[#allocation16_spill] sm:$0xff] }
  0x99   : > { %v2561_v33 = vpop.permute.xlu0 %2560  ;;  %988 = vperm.xlu1 %2795, %v930_v3   ;;  %v4330_v3 = vld [vmem:[#allocation15_spill] sm:$0xff] }
  0x9a   : > { %v2563_v47 = vunpack.i.h.bf16 %v2561_v33  ;;  %v2562_v54 = vunpack.i.l.bf16 %v2561_v33  ;;  %v615_v10 = vsel %vm614_vm0, %v2567_v18, %v2557_v6  ;;  %v1774_v6 = vpack.c.bf16 %v4331_v4, %v4330_v3 }
  0x9b   : > { %v2571_v59 = vpop.permute.xlu1 %2570  ;;  %1003 = vperm.xlu0 %2794, %v933_v26  }
  0x9c   : > { %v2573_v19 = vunpack.i.h.bf16 %v2571_v59  ;;  %v2572_v30 = vunpack.i.l.bf16 %v2571_v59  ;;  %v618_v38 = vsel %vm614_vm0, %v2562_v54, %v2563_v47  ;;  %v617_v34 = vsel %vm614_vm0, %v2568_v42, %v2562_v54  ;;  %v4332_v54 = vld [vmem:[#allocation12_spill] sm:$0xff] }
  0x9d   : > { %v2576_v37 = vpop.permute.xlu0 %2575  ;;  %v857_v48 = vpack.c.bf16 %v618_v38, %v616_v62  ;;  %v856_v41 = vpack.c.bf16 %v617_v34, %v615_v10  ;;  %998 = vperm.xlu1 %2795, %v932_v55   ;;  %v4333_v55 = vld [vmem:[#allocation14_spill] sm:$0xff]  ;;  %v4335_v38 = vld [vmem:[#allocation20_spill] sm:$0xff] }
  0x9e   : > { %v2578_v22 = vunpack.i.h.bf16 %v2576_v37  ;;  %v2577_v13 = vunpack.i.l.bf16 %v2576_v37  ;;  %v620_v24 = vsel %vm614_vm0, %v2572_v30, %v2573_v19  ;;  %v1776_v59 = vpack.c.bf16 %v4333_v55, %v4332_v54 }
  0x9f   : > { %v2581_v63 = vpop.permute.xlu1 %2580  ;;  %1160 = vmatprep.subr.bf16.mxu0 %v857_v48  ;;  %1013 = vperm.xlu0 %2794, %v935_v60  }
  0xa0   : > { %v2583_v8 = vunpack.i.h.bf16 %v2581_v63  ;;  %v2582_v27 = vunpack.i.l.bf16 %v2581_v63  ;;  %1161 = vmatpush1.bf16.msra.mxu0 %v856_v41  ;;  %v622_v52 = vsel %vm614_vm0, %v2577_v13, %v2578_v22  ;;  %v4337_v63 = vld [vmem:[#allocation19_spill] sm:$0xff] }
  0xa1   : > { %v2586_v56 = vpop.permute.xlu0 %2585  ;;  %v859_v9 = vpack.c.bf16 %v622_v52, %v620_v24  ;;  %1008 = vperm.xlu1 %2795, %v934_v43   ;;  %v4336_v43 = vld [vmem:[#allocation17_spill] sm:$0xff] }
  0xa2   : > { %v2588_v14 = vunpack.i.h.bf16 %v2586_v56  ;;  %v2587_v28 = vunpack.i.l.bf16 %v2586_v56  ;;  %v619_v21 = vsel %vm614_vm0, %v2582_v27, %v2572_v30  ;;  %v621_v29 = vsel %vm614_vm0, %v2583_v8, %v2577_v13  ;;  %v4334_v30 = vld [vmem:[#allocation18_spill] sm:$0xff]  ;;  %v4338_v56 = vld [vmem:[#allocation23_spill] sm:$0xff] }
  0xa3   : > { %v2591_v35 = vpop.permute.xlu1 %2590  ;;  %1162 = vmatprep.subr.bf16.mxu0 %v859_v9  ;;  %v858_v20 = vpack.c.bf16 %v621_v29, %v619_v21  ;;  %1967 = vrot.lane.b32.xlu0 %v1773_v58, %s2908_s18  ;;  %v1779_v34 = vpack.c.bf16 %v4335_v38, %v4334_v30  ;;  %v1778_v16 = vpack.c.bf16 %v4337_v63, %v4336_v43  ;;  %v4339_v9 = vld [vmem:[#allocation25_spill] sm:$0xff]  ;;  %v4341_v29 = vld [vmem:[#allocation22_spill] sm:$0xff] }
  0xa4   : > { %v2593_v12 = vunpack.i.h.bf16 %v2591_v35  ;;  %v2592_v0 = vunpack.i.l.bf16 %v2591_v35  ;;  %v624_v5 = vsel %vm614_vm0, %v2587_v28, %v2588_v14  ;;  %v1781_v15 = vpack.c.bf16 %v4339_v9, %v4338_v56  ;;  %v4340_v21 = vld [vmem:[#allocation21_spill] sm:$0xff] }
  0xa5   : > { %1163 = vmatpush1.bf16.msra.mxu0 %v858_v20  ;;  %v2596_v32 = vpop.permute.xlu0 %2595  ;;  %1965 = vrot.lane.b32.xlu1 %v1772_v25, %s2908_s18  ;;  %v1777_v35 = vpack.c.bf16 %v4341_v29, %v4340_v21 }
  0xa6   : > { %v2598_v49 = vunpack.i.h.bf16 %v2596_v32  ;;  %v2597_v50 = vunpack.i.l.bf16 %v2596_v32  ;;  %v626_v51 = vsel %vm614_vm0, %v2592_v0, %v2593_v12 }
  0xa7   : > { %v2601_v57 = vpop.permute.xlu1 %2600  ;;  %v861_v61 = vpack.c.bf16 %v626_v51, %v624_v5  ;;  %1971 = vrot.lane.b32.xlu0 %v1775_v2, %s2908_s18  ;;  %v4343_v5 = vld [vmem:[#allocation28_spill] sm:$0xff] }
  0xa8   : > { %v2603_v11 = vunpack.i.h.bf16 %v2601_v57  ;;  %v2602_v18 = vunpack.i.l.bf16 %v2601_v57  ;;  %v623_v26 = vsel %vm614_vm0, %v2597_v50, %v2587_v28  ;;  %v625_v33 = vsel %vm614_vm0, %v2598_v49, %v2592_v0  ;;  %v4342_v0 = vld [vmem:[#allocation27_spill] sm:$0xff]  ;;  %v4344_v57 = vld [vmem:[#allocation24_spill] sm:$0xff] }
  0xa9   : > { %1164 = vmatprep.subr.bf16.mxu0 %v861_v61  ;;  %v2606_v42 = vpop.permute.xlu0 %2605  ;;  %v860_v47 = vpack.c.bf16 %v625_v33, %v623_v26  ;;  %1963 = vrot.lane.b32.xlu1 %v1771_v46, %s2908_s18  ;;  %v1780_v32 = vpack.c.bf16 %v4343_v5, %v4342_v0  ;;  %v4345_v61 = vld [vmem:[#allocation26_spill] sm:$0xff]  ;;  %v4347_v26 = vld [vmem:[#allocation32_spill] sm:$0xff] }
  0xaa   : > { %v2608_v62 = vunpack.i.h.bf16 %v2606_v42  ;;  %v2607_v10 = vunpack.i.l.bf16 %v2606_v42  ;;  %v628_v48 = vsel %vm614_vm0, %v2602_v18, %v2603_v11  ;;  %v1782_v3 = vpack.c.bf16 %v4345_v61, %v4344_v57 }
  0xab   : > { %v2611_v19 = vpop.permute.xlu1 %2610  ;;  %1165 = vmatpush1.bf16.msra.mxu0 %v860_v47  ;;  %1969 = vrot.lane.b32.xlu0 %v1774_v6, %s2908_s18 }
  0xac   : > { %v2613_v60 = vunpack.i.h.bf16 %v2611_v19  ;;  %v2612_v37 = vunpack.i.l.bf16 %v2611_v19  ;;  %v630_v41 = vsel %vm614_vm0, %v2607_v10, %v2608_v62  ;;  %v4349_v19 = vld [vmem:[#allocation31_spill] sm:$0xff] }
  0xad   : > { %v2616_v22 = vpop.permute.xlu0 %2615  ;;  %v863_v13 = vpack.c.bf16 %v630_v41, %v628_v48  ;;  %1973 = vrot.lane.b32.xlu1 %v1776_v59, %s2908_s18 }
  0xae   : > { %v2618_v53 = vunpack.i.h.bf16 %v2616_v22  ;;  %v2617_v58 = vunpack.i.l.bf16 %v2616_v22  ;;  %v627_v8 = vsel %vm614_vm0, %v2612_v37, %v2602_v18  ;;  %v629_v27 = vsel %vm614_vm0, %v2613_v60, %v2607_v10  ;;  %v4346_v18 = vld [vmem:[#allocation30_spill] sm:$0xff]  ;;  %v4348_v10 = vld [vmem:[#allocation29_spill] sm:$0xff]  ;;  %v4350_v22 = vld [vmem:[#allocation35_spill] sm:$0xff] }
  0xaf   : > { %v2621_v24 = vpop.permute.xlu1 %2620  ;;  %1166 = vmatprep.subr.bf16.mxu0 %v863_v13  ;;  %v862_v52 = vpack.c.bf16 %v629_v27, %v627_v8  ;;  %1979 = vrot.lane.b32.xlu0 %v1779_v34, %s2908_s18  ;;  %v1785_v33 = vpack.c.bf16 %v4347_v26, %v4346_v18  ;;  %v1784_v30 = vpack.c.bf16 %v4349_v19, %v4348_v10  ;;  %v4351_v13 = vld [vmem:[#allocation37_spill] sm:$0xff]  ;;  %v4353_v27 = vld [vmem:[#allocation34_spill] sm:$0xff] }
  0xb0   : > { %v2623_v17 = vunpack.i.h.bf16 %v2621_v24  ;;  %v2622_v25 = vunpack.i.l.bf16 %v2621_v24  ;;  %v632_v14 = vsel %vm614_vm0, %v2617_v58, %v2618_v53  ;;  %v1787_v43 = vpack.c.bf16 %v4351_v13, %v4350_v22  ;;  %v4352_v8 = vld [vmem:[#allocation33_spill] sm:$0xff]  ;;  %v4364_v22 = vld [vmem:[#allocation46_spill] sm:$0xff] }
  0xb1   : > { %1167 = vmatpush1.bf16.msra.mxu0 %v862_v52  ;;  %v2626_v28 = vpop.permute.xlu0 %2625  ;;  %1977 = vrot.lane.b32.xlu1 %v1778_v16, %s2908_s18  ;;  %v1783_v24 = vpack.c.bf16 %v4353_v27, %v4352_v8 }
  0xb2   : > { %v2628_v20 = vunpack.i.h.bf16 %v2626_v28  ;;  %v2627_v36 = vunpack.i.l.bf16 %v2626_v28  ;;  %v634_v39 = vsel %vm614_vm0, %v2622_v25, %v2623_v17 }
  0xb3   : > { %v2631_v2 = vpop.permute.xlu1 %2630  ;;  %v865_v12 = vpack.c.bf16 %v634_v39, %v632_v14  ;;  %1983 = vrot.lane.b32.xlu0 %v1781_v15, %s2908_s18  ;;  %v4355_v14 = vld [vmem:[#allocation40_spill] sm:$0xff] }
  0xb4   : > { %v2633_v44 = vunpack.i.h.bf16 %v2631_v2  ;;  %v2632_v45 = vunpack.i.l.bf16 %v2631_v2  ;;  %v631_v46 = vsel %vm614_vm0, %v2627_v36, %v2617_v58  ;;  %v633_v49 = vsel %vm614_vm0, %v2628_v20, %v2622_v25  ;;  %v4354_v25 = vld [vmem:[#allocation39_spill] sm:$0xff]  ;;  %v4356_v2 = vld [vmem:[#allocation36_spill] sm:$0xff] }
  0xb5   : > { %1168 = vmatprep.subr.bf16.mxu0 %v865_v12  ;;  %v2636_v50 = vpop.permute.xlu0 %2635  ;;  %v864_v51 = vpack.c.bf16 %v633_v49, %v631_v46  ;;  %1975 = vrot.lane.b32.xlu1 %v1777_v35, %s2908_s18  ;;  %v1786_v28 = vpack.c.bf16 %v4355_v14, %v4354_v25  ;;  %v4357_v12 = vld [vmem:[#allocation38_spill] sm:$0xff]  ;;  %v4359_v46 = vld [vmem:[#allocation44_spill] sm:$0xff] }
  0xb6   : > { %v2638_v4 = vunpack.i.h.bf16 %v2636_v50  ;;  %v2637_v6 = vunpack.i.l.bf16 %v2636_v50  ;;  %v636_v54 = vsel %vm614_vm0, %v2632_v45, %v2633_v44  ;;  %v1788_v0 = vpack.c.bf16 %v4357_v12, %v4356_v2 }
  0xb7   : > { %v2641_v11 = vpop.permute.xlu1 %2640  ;;  %1169 = vmatpush1.bf16.msra.mxu0 %v864_v51  ;;  %1981 = vrot.lane.b32.xlu0 %v1780_v32, %s2908_s18 }
  0xb8   : > { %v2643_v42 = vunpack.i.h.bf16 %v2641_v11  ;;  %v2642_v47 = vunpack.i.l.bf16 %v2641_v11  ;;  %v638_v55 = vsel %vm614_vm0, %v2637_v6, %v2638_v4  ;;  %v4361_v11 = vld [vmem:[#allocation43_spill] sm:$0xff] }
  0xb9   : > { %v2646_v59 = vpop.permute.xlu0 %2645  ;;  %v867_v62 = vpack.c.bf16 %v638_v55, %v636_v54  ;;  %1985 = vrot.lane.b32.xlu1 %v1782_v3, %s2908_s18 }
  0xba   : > { %v2648_v38 = vunpack.i.h.bf16 %v2646_v59  ;;  %v2647_v34 = vunpack.i.l.bf16 %v2646_v59  ;;  %v635_v60 = vsel %vm614_vm0, %v2642_v47, %v2632_v45  ;;  %v637_v37 = vsel %vm614_vm0, %v2643_v42, %v2637_v6  ;;  %v4358_v45 = vld [vmem:[#allocation42_spill] sm:$0xff]  ;;  %v4360_v6 = vld [vmem:[#allocation41_spill] sm:$0xff]  ;;  %v4362_v59 = vld [vmem:[#allocation47_spill] sm:$0xff] }
  0xbb   : > { %v2651_v48 = vpop.permute.xlu1 %2650  ;;  %1170 = vmatprep.subr.bf16.mxu0 %v867_v62  ;;  %v866_v41 = vpack.c.bf16 %v637_v37, %v635_v60  ;;  %1991 = vrot.lane.b32.xlu0 %v1785_v33, %s2908_s18  ;;  %v1791_v49 = vpack.c.bf16 %v4359_v46, %v4358_v45  ;;  %v1790_v18 = vpack.c.bf16 %v4361_v11, %v4360_v6  ;;  %v2799_v60 = vld [vmem:[%s4222_s1 + $0x1c] ss:$12 sps:$4 sm:$0xff]   ;;  %v1500_v6 = vld [vmem:[%s4225_s4 + $0x10] sm:$0xff] }
  0xbc   : > { %v2653_v63 = vunpack.i.h.bf16 %v2651_v48  ;;  %v2652_v16 = vunpack.i.l.bf16 %v2651_v48  ;;  %v640_v53 = vsel %vm614_vm0, %v2647_v34, %v2648_v38  ;;  %v1793_v62 = vpack.c.bf16 %v3418_v23, %v4362_v59  ;;  %v2805_v59 = vld [vmem:[%s4222_s1 + $0x4c] ss:$12 sps:$4 sm:$0xff]  }
  0xbd   : > { %1171 = vmatpush1.bf16.msra.mxu0 %v866_v41  ;;  %v2656_v58 = vpop.permute.xlu0 %2655  ;;  %1989 = vrot.lane.b32.xlu1 %v1784_v30, %s2908_s18  ;;  %v2796_v30 = vld [vmem:[%s4222_s1] ss:$12 sps:$4 sm:$0xff]  }
  0xbe   : > { %v2658_v52 = vunpack.i.h.bf16 %v2656_v58  ;;  %v2657_v56 = vunpack.i.l.bf16 %v2656_v58  ;;  %v642_v9 = vsel %vm614_vm0, %v2652_v16, %v2653_v63  ;;  %v4363_v41 = vld [vmem:[#allocation45_spill] sm:$0xff] }
  0xbf   : > { %v2661_v15 = vpop.permute.xlu1 %2660  ;;  %v869_v17 = vpack.c.bf16 %v642_v9, %v640_v53  ;;  %1995 = vrot.lane.b32.xlu0 %v1787_v43, %s2908_s18  ;;  %v1789_v13 = vpack.c.bf16 %v4364_v22, %v4363_v41 }
  0xc0   : > { %v2663_v21 = vunpack.i.h.bf16 %v2661_v15  ;;  %v2662_v29 = vunpack.i.l.bf16 %v2661_v15  ;;  %v639_v35 = vsel %vm614_vm0, %v2657_v56, %v2647_v34  ;;  %v641_v20 = vsel %vm614_vm0, %v2658_v52, %v2652_v16 }
  0xc1   : > { %1172 = vmatprep.subr.bf16.mxu0 %v869_v17  ;;  %v2666_v36 = vpop.permute.xlu0 %2665  ;;  %v868_v39 = vpack.c.bf16 %v641_v20, %v639_v35  ;;  %1987 = vrot.lane.b32.xlu1 %v1783_v24, %s2908_s18  ;;  %v1792_v16 = vpack.c.bf16 %v3449_v31, %v3442_v7  ;;  %v4365_v17 = vld [vmem:[#allocation48_spill] sm:$0xff] }
  0xc2   : > { %v2668_v5 = vunpack.i.h.bf16 %v2666_v36  ;;  %v2667_v32 = vunpack.i.l.bf16 %v2666_v36  ;;  %v644_v57 = vsel %vm614_vm0, %v2662_v29, %v2663_v21  ;;  %v1794_v7 = vpack.c.bf16 %v3429_v40, %v4365_v17  ;;  %v2802_v40 = vld [vmem:[%s4222_s1 + $0x34] ss:$12 sps:$4 sm:$0xff]  }
  0xc3   : > { %v2671_v44 = vpop.permute.xlu1 %2670  ;;  %1173 = vmatpush1.bf16.msra.mxu0 %v868_v39  ;;  %1993 = vrot.lane.b32.xlu0 %v1786_v28, %s2908_s18  ;;  %v2801_v28 = vld [vmem:[%s4222_s1 + $0x18] ss:$12 sps:$4 sm:$0xff]  }
  0xc4   : > { %v2673_v50 = vunpack.i.h.bf16 %v2671_v44  ;;  %v2672_v51 = vunpack.i.l.bf16 %v2671_v44  ;;  %v646_v61 = vsel %vm614_vm0, %v2667_v32, %v2668_v5 }
  0xc5   : > { %v2676_v3 = vpop.permute.xlu0 %2675  ;;  %v871_v4 = vpack.c.bf16 %v646_v61, %v644_v57  ;;  %1997 = vrot.lane.b32.xlu1 %v1788_v0, %s2908_s18 }
  0xc6   : > { %v2678_v26 = vunpack.i.h.bf16 %v2676_v3  ;;  %v2677_v33 = vunpack.i.l.bf16 %v2676_v3  ;;  %v643_v42 = vsel %vm614_vm0, %v2672_v51, %v2662_v29  ;;  %v645_v47 = vsel %vm614_vm0, %v2673_v50, %v2667_v32  ;;  %v1499_v29 = vld [vmem:[%s4225_s4 + $0x8] sm:$0xff]  ;;  %v1498_v32 = vld [vmem:[%s4225_s4] sm:$0xff] }
  0xc7   : > { %v2681_v54 = vpop.permute.xlu1 %2680  ;;  %1174 = vmatprep.subr.bf16.mxu0 %v871_v4  ;;  %v870_v55 = vpack.c.bf16 %v645_v47, %v643_v42  ;;  %2003 = vrot.lane.b32.xlu0 %v1791_v49, %s2908_s18  ;;  %v1501_v49 = vld [vmem:[%s4225_s4 + $0x18] sm:$0xff]  ;;  %v1503_v47 = vld [vmem:[%s4225_s4 + $0x28] sm:$0xff] }
  0xc8   : > { %v2683_v10 = vunpack.i.h.bf16 %v2681_v54  ;;  %v2682_v19 = vunpack.i.l.bf16 %v2681_v54  ;;  %v777_v38 = vsel %vm775_vm1, %v2677_v33, %v2678_v26  ;;  %v2804_v42 = vld [vmem:[%s4222_s1 + $0x30] ss:$12 sps:$4 sm:$0xff]  }
  0xc9   : > { %1175 = vmatpush1.bf16.msra.mxu0 %v870_v55  ;;  %v2686_v34 = vpop.permute.xlu0 %2685  ;;  %2001 = vrot.lane.b32.xlu1 %v1790_v18, %s2908_s18 }
  0xca   : > { %v2688_v37 = vunpack.i.h.bf16 %v2686_v34  ;;  %v2687_v48 = vunpack.i.l.bf16 %v2686_v34  ;;  %v779_v23 = vsel %vm775_vm1, %v2682_v19, %v2683_v10 }
  0xcb   : > { %v2691_v43 = vpop.permute.xlu1 %2690  ;;  %v873_v63 = vpack.c.bf16 %v779_v23, %v777_v38  ;;  %2007 = vrot.lane.b32.xlu0 %v1793_v62, %s2908_s18  ;;  %v1502_v38 = vld [vmem:[%s4225_s4 + $0x20] sm:$0xff] }
  0xcc   : > { %v776_v53 = vsel %vm775_vm1, %v2687_v48, %v2677_v33  ;;  %v778_v58 = vsel %vm775_vm1, %v2688_v37, %v2682_v19  ;;  %v2693_v8 = vunpack.i.h.bf16 %v2691_v43  ;;  %v2692_v27 = vunpack.i.l.bf16 %v2691_v43  ;;  %1177 = vmatmul.mubr.bf16.vlgmr.msra.gmra.mrb[0].mxu0 %v2796_v30  ;;  %v1505_v48 = vld [vmem:[%s4225_s4 + $0x38] sm:$0xff] }
  0xcd   : > { %v872_v24 = vpack.c.bf16 %v778_v58, %v776_v53  ;;  %1257 = vmatprep.subr.bf16.mxu0 %v873_v63  ;;  %v2696_v52 = vpop.permute.xlu0 %2695  ;;  %1186 = vmatprep.mubr.bf16.mxu0 %v2799_v60  ;;  %v1504_v58 = vld [vmem:[%s4225_s4 + $0x30] sm:$0xff] }
  0xce   : > { %v2698_v56 = vunpack.i.h.bf16 %v2696_v52  ;;  %v2697_v9 = vunpack.i.l.bf16 %v2696_v52  ;;  %v781_v15 = vsel %vm775_vm1, %v2692_v27, %v2693_v8  ;;  %1999 = vrot.lane.b32.xlu1 %v1789_v13, %s2908_s18  ;;  %v2807_v8 = vld [vmem:[%s4222_s1 + $0x48] ss:$12 sps:$4 sm:$0xff]  }
  0xcf   : > { %v2701_v31 = vpop.permute.xlu1 %2700  ;;  %1258 = vmatpush1.bf16.msra.mxu0 %v872_v24  ;;  %2005 = vrot.lane.b32.xlu0 %v1792_v16, %s2908_s18 }
  0xd0   : > { %v2703_v25 = vunpack.i.h.bf16 %v2701_v31  ;;  %v2702_v14 = vunpack.i.l.bf16 %v2701_v31  ;;  %v783_v21 = vsel %vm775_vm1, %v2697_v9, %v2698_v56  ;;  %v1507_v56 = vld [vmem:[%s4225_s4 + $0x48] sm:$0xff] }
  0xd1   : > { %v2706_v35 = vpop.permute.xlu0 %2705  ;;  %v875_v20 = vpack.c.bf16 %v783_v21, %v781_v15  ;;  %v2808_v15 = vld [vmem:[%s4222_s1 + $0x64] ss:$12 sps:$4 sm:$0xff]  }
  0xd2   : > { %v782_v36 = vsel %vm775_vm1, %v2703_v25, %v2697_v9  ;;  %v780_v39 = vsel %vm775_vm1, %v2702_v14, %v2692_v27  ;;  %v2708_v2 = vunpack.i.h.bf16 %v2706_v35  ;;  %v2707_v12 = vunpack.i.l.bf16 %v2706_v35  ;;  %2009 = vrot.lane.b32.xlu1 %v1794_v7, %s2908_s18 }
  0xd3   : > { %v874_v0 = vpack.c.bf16 %v782_v36, %v780_v39  ;;  %1259 = vmatprep.subr.bf16.mxu0 %v875_v20  ;;  %v2711_v5 = vpop.permute.xlu1 %2710  ;;  %1521 = vperm.xlu0 %2794, %v1499_v29  }
  0xd4   : > { %1187 = vmatmul.mubr.bf16.gmra.mrb[4].mxu0 %v2801_v28  ;;  %v2713_v44 = vunpack.i.h.bf16 %v2711_v5  ;;  %v2712_v45 = vunpack.i.l.bf16 %v2711_v5  ;;  %v785_v46 = vsel %vm775_vm1, %v2707_v12, %v2708_v2  ;;  %v1506_v28 = vld [vmem:[%s4225_s4 + $0x40] sm:$0xff] }
  0xd5   : > { %1260 = vmatpush1.bf16.msra.mxu0 %v874_v0  ;;  %v2716_v50 = vpop.permute.xlu0 %2715  ;;  %1196 = vmatprep.mubr.bf16.mxu0 %v2802_v40  ;;  %v1509_v40 = vld [vmem:[%s4225_s4 + $0x58] sm:$0xff] }
  0xd6   : > { %v2718_v51 = vunpack.i.h.bf16 %v2716_v50  ;;  %v2717_v57 = vunpack.i.l.bf16 %v2716_v50  ;;  %v787_v61 = vsel %vm775_vm1, %v2712_v45, %v2713_v44  ;;  %1516 = vperm.xlu1 %2795, %v1498_v32   ;;  %v1508_v32 = vld [vmem:[%s4225_s4 + $0x50] sm:$0xff]  ;;  %v2810_v44 = vld [vmem:[%s4222_s1 + $0x60] ss:$12 sps:$4 sm:$0xff]  }
  0xd7   : > { %v2721_v3 = vpop.permute.xlu1 %2720  ;;  %v877_v4 = vpack.c.bf16 %v787_v61, %v785_v46  ;;  %1531 = vperm.xlu0 %2794, %v1501_v49   ;;  %v1511_v50 = vld [vmem:[%s4225_s4 + $0x68] sm:$0xff] }
  0xd8   : > { %v784_v11 = vsel %vm775_vm1, %v2717_v57, %v2707_v12  ;;  %v786_v18 = vsel %vm775_vm1, %v2718_v51, %v2712_v45  ;;  %v2723_v26 = vunpack.i.h.bf16 %v2721_v3  ;;  %v2722_v33 = vunpack.i.l.bf16 %v2721_v3  ;;  %v2811_v57 = vld [vmem:[%s4222_s1 + $0x7c] ss:$12 sps:$4 sm:$0xff]  }
  0xd9   : > { %v876_v54 = vpack.c.bf16 %v786_v18, %v784_v11  ;;  %1261 = vmatprep.subr.bf16.mxu0 %v877_v4  ;;  %v2726_v55 = vpop.permute.xlu0 %2725 }
  0xda   : > { %v2728_v62 = vunpack.i.h.bf16 %v2726_v55  ;;  %v2727_v10 = vunpack.i.l.bf16 %v2726_v55  ;;  %v789_v19 = vsel %vm775_vm1, %v2722_v33, %v2723_v26  ;;  %1526 = vperm.xlu1 %2795, %v1500_v6   ;;  %v1513_v55 = vld [vmem:[%s4225_s4 + $0x78] sm:$0xff] }
  0xdb   : > { %1262 = vmatpush1.bf16.msra.mxu0 %v876_v54  ;;  %v2731_v30 = vpop.permute.xlu1 %2730  ;;  %1541 = vperm.xlu0 %2794, %v1503_v47  }
  0xdc   : > { %1197 = vmatmul.mubr.bf16.gmra.mrb[8].mxu0 %v2804_v42  ;;  %v2733_v34 = vunpack.i.h.bf16 %v2731_v30  ;;  %v2732_v60 = vunpack.i.l.bf16 %v2731_v30  ;;  %v791_v37 = vsel %vm775_vm1, %v2727_v10, %v2728_v62 }
  0xdd   : > { %v2736_v23 = vpop.permute.xlu0 %2735  ;;  %1206 = vmatprep.mubr.bf16.mxu0 %v2805_v59  ;;  %v879_v41 = vpack.c.bf16 %v791_v37, %v789_v19 }
  0xde   : > { %v790_v22 = vsel %vm775_vm1, %v2733_v34, %v2727_v10  ;;  %v788_v13 = vsel %vm775_vm1, %v2732_v60, %v2722_v33  ;;  %v2738_v43 = vunpack.i.h.bf16 %v2736_v23  ;;  %v2737_v63 = vunpack.i.l.bf16 %v2736_v23  ;;  %1536 = vperm.xlu1 %2795, %v1502_v38   ;;  %v1510_v33 = vld [vmem:[%s4225_s4 + $0x60] sm:$0xff]  ;;  %v1512_v34 = vld [vmem:[%s4225_s4 + $0x70] sm:$0xff] }
  0xdf   : > { %v878_v16 = vpack.c.bf16 %v790_v22, %v788_v13  ;;  %1263 = vmatprep.subr.bf16.mxu0 %v879_v41  ;;  %v2741_v53 = vpop.permute.xlu1 %2740  ;;  %1551 = vperm.xlu0 %2794, %v1505_v48   ;;  %v2813_v60 = vld [vmem:[%s4222_s1 + $0x78] ss:$12 sps:$4 sm:$0xff]   ;;  %v1796_v22 = vld [vmem:[%s4227_s6 + $0x8] sm:$0xff] }
  0xe0   : > { %v2743_v27 = vunpack.i.h.bf16 %v2741_v53  ;;  %v2742_v24 = vunpack.i.l.bf16 %v2741_v53  ;;  %v793_v52 = vsel %vm775_vm1, %v2737_v63, %v2738_v43  ;;  %v2814_v43 = vld [vmem:[%s4222_s1 + $0x94] ss:$12 sps:$4 sm:$0xff]  }
  0xe1   : > { %1264 = vmatpush1.bf16.msra.mxu0 %v878_v16  ;;  %v2746_v9 = vpop.permute.xlu0 %2745 }
  0xe2   : > { %v2748_v17 = vunpack.i.h.bf16 %v2746_v9  ;;  %v2747_v7 = vunpack.i.l.bf16 %v2746_v9  ;;  %v795_v31 = vsel %vm775_vm1, %v2742_v24, %v2743_v27  ;;  %1546 = vperm.xlu1 %2795, %v1504_v58   ;;  %v1795_v27 = vld [vmem:[%s4227_s6] sm:$0xff]  ;;  %v1798_v9 = vld [vmem:[%s4227_s6 + $0x18] sm:$0xff] }
  0xe3   : > { %v2751_v25 = vpop.permute.xlu1 %2750  ;;  %v881_v14 = vpack.c.bf16 %v795_v31, %v793_v52  ;;  %1561 = vperm.xlu0 %2794, %v1507_v56  }
  0xe4   : > { %1207 = vmatmul.mubr.bf16.gmra.mrb[12].mxu0 %v2807_v8  ;;  %v792_v21 = vsel %vm775_vm1, %v2747_v7, %v2737_v63  ;;  %v794_v29 = vsel %vm775_vm1, %v2748_v17, %v2742_v24  ;;  %v2753_v35 = vunpack.i.h.bf16 %v2751_v25  ;;  %v2752_v20 = vunpack.i.l.bf16 %v2751_v25  ;;  %v1797_v25 = vld [vmem:[%s4227_s6 + $0x10] sm:$0xff] }
  0xe5   : > { %v880_v36 = vpack.c.bf16 %v794_v29, %v792_v21  ;;  %1216 = vmatprep.mubr.bf16.mxu0 %v2808_v15  ;;  %1265 = vmatprep.subr.bf16.mxu0 %v881_v14  ;;  %v2756_v39 = vpop.permute.xlu0 %2755  ;;  %v2816_v14 = vld [vmem:[%s4222_s1 + $0x90] ss:$12 sps:$4 sm:$0xff]   ;;  %v2817_v21 = vld [vmem:[%s4222_s1 + $0xac] ss:$12 sps:$4 sm:$0xff]   ;;  %v1799_v29 = vld [vmem:[%s4227_s6 + $0x20] sm:$0xff] }
  0xe6   : > { %v2758_v2 = vunpack.i.h.bf16 %v2756_v39  ;;  %v2757_v12 = vunpack.i.l.bf16 %v2756_v39  ;;  %v797_v0 = vsel %vm775_vm1, %v2752_v20, %v2753_v35  ;;  %1556 = vperm.xlu1 %2795, %v1506_v28   ;;  %v1800_v28 = vld [vmem:[%s4227_s6 + $0x28] sm:$0xff]  ;;  %v1802_v35 = vld [vmem:[%s4227_s6 + $0x38] sm:$0xff]  ;;  %v1803_v39 = vld [vmem:[%s4227_s6 + $0x40] sm:$0xff] }
  0xe7   : > { %1266 = vmatpush1.bf16.msra.mxu0 %v880_v36  ;;  %v2761_v5 = vpop.permute.xlu1 %2760  ;;  %1571 = vperm.xlu0 %2794, %v1509_v40   ;;  %v2819_v40 = vld [vmem:[%s4222_s1 + $0xa8] ss:$12 sps:$4 sm:$0xff]  }
  0xe8   : > { %v2763_v45 = vunpack.i.h.bf16 %v2761_v5  ;;  %v2762_v46 = vunpack.i.l.bf16 %v2761_v5  ;;  %v799_v49 = vsel %vm775_vm1, %v2757_v12, %v2758_v2  ;;  %v1804_v36 = vld [vmem:[%s4227_s6 + $0x48] sm:$0xff]  ;;  %v1806_v2 = vld [vmem:[%s4227_s6 + $0x58] sm:$0xff] }
  0xe9   : > { %v2766_v51 = vpop.permute.xlu0 %2765  ;;  %v883_v61 = vpack.c.bf16 %v799_v49, %v797_v0  ;;  %v2820_v0 = vld [vmem:[%s4222_s1 + $0x8] ss:$12 sps:$4 sm:$0xff]   ;;  %v2822_v49 = vld [vmem:[%s4222_s1 + $0x38] ss:$12 sps:$4 sm:$0xff]  }
  0xea   : > { %v798_v3 = vsel %vm775_vm1, %v2763_v45, %v2757_v12  ;;  %v796_v4 = vsel %vm775_vm1, %v2762_v46, %v2752_v20  ;;  %v2768_v6 = vunpack.i.h.bf16 %v2766_v51  ;;  %v2767_v11 = vunpack.i.l.bf16 %v2766_v51  ;;  %1566 = vperm.xlu1 %2795, %v1508_v32   ;;  %v1801_v20 = vld [vmem:[%s4227_s6 + $0x30] sm:$0xff]  ;;  %v1808_v5 = vld [vmem:[%s4227_s6 + $0x68] sm:$0xff]  ;;  %v1807_v32 = vld [vmem:[%s4227_s6 + $0x60] sm:$0xff] }
  0xeb   : > { %v882_v18 = vpack.c.bf16 %v798_v3, %v796_v4  ;;  %1267 = vmatprep.subr.bf16.mxu0 %v883_v61  ;;  %v2771_v26 = vpop.permute.xlu1 %2770  ;;  %1581 = vperm.xlu0 %2794, %v1511_v50   ;;  %v1805_v12 = vld [vmem:[%s4227_s6 + $0x50] sm:$0xff]  ;;  %v2821_v46 = vld [vmem:[%s4222_s1 + $0x20] ss:$12 sps:$4 sm:$0xff]   ;;  %v2826_v61 = vld [vmem:[%s4222_s1 + $0x98] ss:$12 sps:$4 sm:$0xff]  }
  0xec   : > { %1217 = vmatmul.mubr.bf16.gmra.mrb[16].mxu0 %v2810_v44  ;;  %v2773_v42 = vunpack.i.h.bf16 %v2771_v26  ;;  %v2772_v47 = vunpack.i.l.bf16 %v2771_v26  ;;  %v801_v54 = vsel %vm775_vm1, %v2767_v11, %v2768_v6  ;;  %v1810_v44 = vld [vmem:[%s4227_s6 + $0x78] sm:$0xff]  ;;  %v1809_v45 = vld [vmem:[%s4227_s6 + $0x70] sm:$0xff] }
  0xed   : > { %1226 = vmatprep.mubr.bf16.mxu0 %v2811_v57  ;;  %1268 = vmatpush1.bf16.msra.mxu0 %v882_v18  ;;  %v2776_v59 = vpop.permute.xlu0 %2775  ;;  %v2823_v50 = vld [vmem:[%s4222_s1 + $0x50] ss:$12 sps:$4 sm:$0xff]   ;;  %v2824_v51 = vld [vmem:[%s4222_s1 + $0x68] ss:$12 sps:$4 sm:$0xff]   ;;  %v2825_v57 = vld [vmem:[%s4222_s1 + $0x80] ss:$12 sps:$4 sm:$0xff]  }
  0xee   : > { %v2778_v62 = vunpack.i.h.bf16 %v2776_v59  ;;  %v2777_v10 = vunpack.i.l.bf16 %v2776_v59  ;;  %v803_v19 = vsel %vm775_vm1, %v2772_v47, %v2773_v42  ;;  %1576 = vperm.xlu1 %2795, %v1510_v33   ;;  %v2827_v3 = vld [vmem:[%s4222_s1 + $0xb0] ss:$12 sps:$4 sm:$0xff]  }
  0xef   : > { %v2781_v30 = vpop.permute.xlu1 %2780  ;;  %v885_v38 = vpack.c.bf16 %v803_v19, %v801_v54  ;;  %1591 = vperm.xlu0 %2794, %v1513_v55  }
  0xf0   : > { %v800_v37 = vsel %vm775_vm1, %v2777_v10, %v2767_v11  ;;  %v802_v48 = vsel %vm775_vm1, %v2778_v62, %v2772_v47  ;;  %v2783_v23 = vunpack.i.h.bf16 %v2781_v30  ;;  %v2782_v41 = vunpack.i.l.bf16 %v2781_v30 }
  0xf1   : > { %v884_v13 = vpack.c.bf16 %v802_v48, %v800_v37  ;;  %1269 = vmatprep.subr.bf16.mxu0 %v885_v38  ;;  %v2786_v63 = vpop.permute.xlu0 %2785 }
  0xf2   : > { %v2788_v16 = vunpack.i.h.bf16 %v2786_v63  ;;  %v2787_v53 = vunpack.i.l.bf16 %v2786_v63  ;;  %v805_v58 = vsel %vm775_vm1, %v2782_v41, %v2783_v23  ;;  %1586 = vperm.xlu1 %2795, %v1512_v34  }
  0xf3   : > { %1270 = vmatpush1.bf16.msra.mxu0 %v884_v13  ;;  %v2791_v8 = vpop.permute.xlu1 %2790  ;;  %1818 = vperm.xlu0 %2794, %v1796_v22  }
  0xf4   : > { %1227 = vmatmul.mubr.bf16.gmra.mrb[20].mxu0 %v2813_v60  ;;  %v2793_v24 = vunpack.i.h.bf16 %v2791_v8  ;;  %v2792_v52 = vunpack.i.l.bf16 %v2791_v8  ;;  %v807_v56 = vsel %vm775_vm1, %v2787_v53, %v2788_v16 }
  0xf5   : > { %1236 = vmatprep.mubr.bf16.mxu0 %v2814_v43  ;;  %v887_v15 = vpack.c.bf16 %v807_v56, %v805_v58 }
  0xf6   : > { %v806_v17 = vsel %vm775_vm1, %v2793_v24, %v2787_v53  ;;  %v804_v7 = vsel %vm775_vm1, %v2792_v52, %v2782_v41  ;;  %1813 = vperm.xlu1 %2795, %v1795_v27  }
  0xf7   : > { %v886_v31 = vpack.c.bf16 %v806_v17, %v804_v7  ;;  %1271 = vmatprep.subr.bf16.mxu0 %v887_v15  ;;  %1828 = vperm.xlu0 %2794, %v1798_v9  }
  0xf9   : > { %1272 = vmatpush1.bf16.msra.mxu0 %v886_v31 }
  0xfa   : > { %1823 = vperm.xlu1 %2795, %v1797_v25  }
  0xfb   : > { %1838 = vperm.xlu0 %2794, %v1800_v28  }
  0xfc   : > { %1237 = vmatmul.mubr.bf16.gmra.mrb[24].mxu0 %v2816_v14 }
  0xfd   : > { %1246 = vmatprep.mubr.bf16.mxu0 %v2817_v21 }
  0xfe   : > { %1833 = vperm.xlu1 %2795, %v1799_v29  }
  0xff   : > { %1848 = vperm.xlu0 %2794, %v1802_v35  }
 0x102   : > { %1843 = vperm.xlu1 %2795, %v1801_v20   ;;  %v939_v6 = vpop.permute.xlu0 %938 }
 0x103   : > { %1858 = vperm.xlu0 %2794, %v1804_v36  }
 0x104   : > { %1247 = vmatmul.mubr.bf16.gmra.mrb[28].mxu0 %v2819_v40  ;;  %v944_v4 = vpop.permute.xlu1 %943 }
 0x105   : > { %1289 = vmatprep.mubr.bf16.mxu0 %v2910_v1 }
 0x106   : > { %1853 = vperm.xlu1 %2795, %v1803_v39   ;;  %v954_v18 = vpop.permute.xlu0 %953 }
 0x107   : > { %1868 = vperm.xlu0 %2794, %v1806_v2  }
 0x108   : > { %v949_v11 = vpop.permute.xlu1 %948 }
 0x10a   : > { %1863 = vperm.xlu1 %2795, %v1805_v12   ;;  %v3948_v33 = vpop.permute.xlu0 %963 }
 0x10b   : > { %1878 = vperm.xlu0 %2794, %v1808_v5  }
 0x10c   : > { %1290 = vmatmul.mubr.bf16.vlgmr.msra.gmra.mrb[0].mxu0 %v2820_v0  ;;  %v959_v26 = vpop.permute.xlu1 %958 }
 0x10d   : > { %1299 = vmatprep.mubr.bf16.mxu0 %v2910_v1 }
 0x10e   : > { %1873 = vperm.xlu1 %2795, %v1807_v32   ;;  %v3952_v47 = vpop.permute.xlu0 %973 }
 0x10f   : > { %1888 = vperm.xlu0 %2794, %v1810_v44  }
 0x110   : > { %v3950_v42 = vpop.permute.xlu1 %968 }
 0x112   : > { %1883 = vperm.xlu1 %2795, %v1809_v45   ;;  %v3956_v23 = vpop.permute.xlu0 %983 }
 0x114   : > { %1300 = vmatmul.mubr.bf16.gmra.mrb[4].mxu0 %v2821_v46  ;;  %v3954_v19 = vpop.permute.xlu1 %978 }
 0x115   : > { %1309 = vmatprep.mubr.bf16.mxu0 %v2910_v1 }
 0x116   : > { %v3960_v7 = vpop.permute.xlu0 %993 }
 0x118   : > { %v3958_v58 = vpop.permute.xlu1 %988 }
 0x11a   : > { %v3964_v5 = vpop.permute.xlu0 %1003 }
 0x11c   : > { %1310 = vmatmul.mubr.bf16.gmra.mrb[8].mxu0 %v2822_v49  ;;  %v3962_v21 = vpop.permute.xlu1 %998 }
 0x11d   : > { %1319 = vmatprep.mubr.bf16.mxu0 %v2910_v1 }
 0x124   : > { %1320 = vmatmul.mubr.bf16.gmra.mrb[12].mxu0 %v2823_v50 }
 0x125   : > { %1329 = vmatprep.mubr.bf16.mxu0 %v2910_v1 }
 0x12c   : > { %1330 = vmatmul.mubr.bf16.gmra.mrb[16].mxu0 %v2824_v51 }
 0x12d   : > { %1339 = vmatprep.mubr.bf16.mxu0 %v2910_v1 }
 0x134   : > { %1340 = vmatmul.mubr.bf16.gmra.mrb[20].mxu0 %v2825_v57  ;;  %v3968_v57 = vpop.permute.xlu1 %1008 }
 0x135   : > { %1349 = vmatprep.mubr.bf16.mxu0 %v2910_v1 }
 0x13c   : > { %1350 = vmatmul.mubr.bf16.gmra.mrb[24].mxu0 %v2826_v61 }
 0x13d   : > { %1359 = vmatprep.mubr.bf16.mxu0 %v2910_v1 }
 0x144   : > { %1360 = vmatmul.mubr.bf16.gmra.mrb[28].mxu0 %v2827_v3 }
 0x1df   : > { %v1291_v54 = vpop.f32.mrb[0].mxu0 }
 0x1e0   : > { %v2349_v55 = vadd.f32 %v1291_v54, %v939_v6  ;;  %v1293_v59 = vpop.f32.mrb[1].mxu0 }
 0x1e1   : > { %v2350_v62 = vadd.f32 %v1293_v59, %v939_v6  ;;  %v1295_v10 = vpop.f32.mrb[2].mxu0 }
 0x1e2   : > { %v1402_v30 = vmul.f32 0.2, %v2349_v55  ;;  %v2351_v38 = vadd.f32 %v1295_v10, %v944_v4  ;;  %v1297_v34 = vpop.f32.mrb[3].mxu0  ;;  %vm1370_vm2 = vcmp.ge.f32.partialorder %v2349_v55, 0.0 }
 0x1e3   : > { %v1403_v60 = vmul.f32 0.2, %v2350_v62  ;;  %v2352_v37 = vadd.f32 %v1297_v34, %v944_v4  ;;  %vm1371_vm3 = vcmp.ge.f32.partialorder %v2350_v62, 0.0 }
 0x1e4   : > { %v1404_v48 = vmul.f32 0.2, %v2351_v38  ;;  %vm1372_vm4 = vcmp.ge.f32.partialorder %v2351_v38, 0.0  ;;  %v1434_v22 = vsel %vm1370_vm2, %v2349_v55, %v1402_v30 }
 0x1e5   : > { %v1405_v41 = vmul.f32 0.2, %v2352_v37  ;;  %vm1373_vm5 = vcmp.ge.f32.partialorder %v2352_v37, 0.0  ;;  %v1435_v63 = vsel %vm1371_vm3, %v2350_v62, %v1403_v60 }
 0x1e6   : > { %v1436_v13 = vsel %vm1372_vm4, %v2351_v38, %v1404_v48  ;;  %v3974_v38 = vpop.permute.xlu1 %1965 }
 0x1e7   : > { %v1301_v43 = vpop.f32.mrb[4].mxu0  ;;  %v1437_v16 = vsel %vm1373_vm5, %v2352_v37, %v1405_v41  ;;  %v1482_v53 = vpack.c.bf16 %v1436_v13, %v1434_v22 }
 0x1e8   : > { %v2353_v8 = vadd.f32 %v1301_v43, %v949_v11  ;;  %v1303_v27 = vpop.f32.mrb[5].mxu0  ;;  %v1483_v24 = vpack.c.bf16 %v1437_v16, %v1435_v63 }
 0x1e9   : > { %v2354_v52 = vadd.f32 %v1303_v27, %v949_v11  ;;  %v1305_v56 = vpop.f32.mrb[6].mxu0  ;;  %v3970_v11 = vpop.permute.xlu0 %1013 }
 0x1ea   : > { %v1406_v9 = vmul.f32 0.2, %v2353_v8  ;;  %v2355_v15 = vadd.f32 %v1305_v56, %v954_v18  ;;  %v1307_v17 = vpop.f32.mrb[7].mxu0  ;;  %1642 = vmatprep.subr.bf16.mxu1 %v1483_v24  ;;  %vm1374_vm6 = vcmp.ge.f32.partialorder %v2353_v8, 0.0  ;;  %v3980_v24 = vpop.permute.xlu1 %1963 }
 0x1eb   : > { %v1407_v31 = vmul.f32 0.2, %v2354_v52  ;;  %v2356_v25 = vadd.f32 %v1307_v17, %v954_v18  ;;  %1643 = vmatpush1.bf16.msra.mxu1 %v1482_v53  ;;  %vm1375_vm7 = vcmp.ge.f32.partialorder %v2354_v52, 0.0 }
 0x1ec   : > { %vm1376_vm8 = vcmp.ge.f32.partialorder %v2355_v15, 0.0  ;;  %v1408_v14 = vmul.f32 0.2, %v2355_v15  ;;  %v1438_v29 = vsel %vm1374_vm6, %v2353_v8, %v1406_v9 }
 0x1ed   : > { %vm1377_vm9 = vcmp.ge.f32.partialorder %v2356_v25, 0.0  ;;  %v1409_v28 = vmul.f32 0.2, %v2356_v25  ;;  %v1439_v40 = vsel %vm1375_vm7, %v2354_v52, %v1407_v31  ;;  %v3978_v13 = vpop.permute.xlu0 %1967 }
 0x1ee   : > { %v1440_v35 = vsel %vm1376_vm8, %v2355_v15, %v1408_v14 }
 0x1ef   : > { %v1311_v20 = vpop.f32.mrb[8].mxu0  ;;  %v1441_v36 = vsel %vm1377_vm9, %v2356_v25, %v1409_v28  ;;  %v1484_v39 = vpack.c.bf16 %v1440_v35, %v1438_v29 }
 0x1f0   : > { %v2357_v2 = vadd.f32 %v1311_v20, %v959_v26  ;;  %v1313_v12 = vpop.f32.mrb[9].mxu0  ;;  %v1485_v0 = vpack.c.bf16 %v1441_v36, %v1439_v40  ;;  %v3988_v40 = vpop.permute.xlu1 %1973 }
 0x1f1   : > { %v2358_v32 = vadd.f32 %v1313_v12, %v959_v26  ;;  %v1315_v44 = vpop.f32.mrb[10].mxu0  ;;  %v3985_v14 = vpop.permute.xlu0 %1971 }
 0x1f2   : > { %v1410_v45 = vmul.f32 0.2, %v2357_v2  ;;  %v2359_v46 = vadd.f32 %v1315_v44, %v3948_v33  ;;  %v1317_v49 = vpop.f32.mrb[11].mxu0  ;;  %1644 = vmatprep.subr.bf16.mxu1 %v1485_v0  ;;  %vm1378_vm10 = vcmp.ge.f32.partialorder %v2357_v2, 0.0 }
 0x1f3   : > { %v1411_v50 = vmul.f32 0.2, %v2358_v32  ;;  %v2360_v51 = vadd.f32 %v1317_v49, %v3948_v33  ;;  %1645 = vmatpush1.bf16.msra.mxu1 %v1484_v39  ;;  %vm1379_vm11 = vcmp.ge.f32.partialorder %v2358_v32, 0.0 }
 0x1f4   : > { %vm1380_vm12 = vcmp.ge.f32.partialorder %v2359_v46, 0.0  ;;  %v1412_v61 = vmul.f32 0.2, %v2359_v46  ;;  %v1442_v4 = vsel %vm1378_vm10, %v2357_v2, %v1410_v45 }
 0x1f5   : > { %vm1381_vm13 = vcmp.ge.f32.partialorder %v2360_v51, 0.0  ;;  %v1413_v3 = vmul.f32 0.2, %v2360_v51  ;;  %v1443_v26 = vsel %vm1379_vm11, %v2358_v32, %v1411_v50 }
 0x1f6   : > { %v1444_v6 = vsel %vm1380_vm12, %v2359_v46, %v1412_v61  ;;  %v3991_v46 = vpop.permute.xlu0 %1969 }
 0x1f7   : > { %v1321_v18 = vpop.f32.mrb[12].mxu0  ;;  %v1445_v54 = vsel %vm1381_vm13, %v2360_v51, %v1413_v3  ;;  %v1486_v55 = vpack.c.bf16 %v1444_v6, %v1442_v4  ;;  %v3996_v6 = vpop.permute.xlu1 %1977 }
 0x1f8   : > { %v2361_v59 = vadd.f32 %v1321_v18, %v3950_v42  ;;  %v1323_v62 = vpop.f32.mrb[13].mxu0  ;;  %v1487_v33 = vpack.c.bf16 %v1445_v54, %v1443_v26 }
 0x1f9   : > { %v2362_v10 = vadd.f32 %v1323_v62, %v3950_v42  ;;  %v1325_v30 = vpop.f32.mrb[14].mxu0 }
 0x1fa   : > { %v1414_v34 = vmul.f32 0.2, %v2361_v59  ;;  %v2363_v60 = vadd.f32 %v1325_v30, %v3952_v47  ;;  %v1327_v37 = vpop.f32.mrb[15].mxu0  ;;  %1646 = vmatprep.subr.bf16.mxu1 %v1487_v33  ;;  %vm1382_vm14 = vcmp.ge.f32.partialorder %v2361_v59, 0.0 }
 0x1fb   : > { %v1415_v48 = vmul.f32 0.2, %v2362_v10  ;;  %v2364_v41 = vadd.f32 %v1327_v37, %v3952_v47  ;;  %1647 = vmatpush1.bf16.msra.mxu1 %v1486_v55  ;;  %vm1383_vm15 = vcmp.ge.f32.partialorder %v2362_v10, 0.0  ;;  %v3998_v55 = vpop.permute.xlu0 %1979 }
 0x1fc   : > { %vm1384_vm1 = vcmp.ge.f32.partialorder %v2363_v60, 0.0  ;;  %v1416_v22 = vmul.f32 0.2, %v2363_v60  ;;  %v1446_v43 = vsel %vm1382_vm14, %v2361_v59, %v1414_v34 }
 0x1fd   : > { %vm1385_vm2 = vcmp.ge.f32.partialorder %v2364_v41, 0.0  ;;  %v1417_v42 = vmul.f32 0.2, %v2364_v41  ;;  %v1447_v53 = vsel %vm1383_vm15, %v2362_v10, %v1415_v48  ;;  %v4002_v48 = vpop.permute.xlu1 %1975 }
 0x1fe   : > { %v1448_v63 = vsel %vm1384_vm1, %v2363_v60, %v1416_v22 }
 0x1ff   : > { %v1331_v16 = vpop.f32.mrb[16].mxu0  ;;  %v1449_v8 = vsel %vm1385_vm2, %v2364_v41, %v1417_v42  ;;  %v1488_v27 = vpack.c.bf16 %v1448_v63, %v1446_v43 }
 0x200   : > { %v2365_v52 = vadd.f32 %v1331_v16, %v3954_v19  ;;  %v1333_v56 = vpop.f32.mrb[17].mxu0  ;;  %v1489_v47 = vpack.c.bf16 %v1449_v8, %v1447_v53  ;;  %v4006_v53 = vpop.permute.xlu0 %1983 }
 0x201   : > { %v2366_v9 = vadd.f32 %v1333_v56, %v3954_v19  ;;  %v1335_v15 = vpop.f32.mrb[18].mxu0 }
 0x202   : > { %v1418_v17 = vmul.f32 0.2, %v2365_v52  ;;  %v2367_v31 = vadd.f32 %v1335_v15, %v3956_v23  ;;  %v1337_v25 = vpop.f32.mrb[19].mxu0  ;;  %1648 = vmatprep.subr.bf16.mxu1 %v1489_v47  ;;  %vm1386_vm3 = vcmp.ge.f32.partialorder %v2365_v52, 0.0  ;;  %v1986_v15 = vpop.permute.xlu1 %1985 }
 0x203   : > { %v1419_v28 = vmul.f32 0.2, %v2366_v9  ;;  %v2368_v29 = vadd.f32 %v1337_v25, %v3956_v23  ;;  %1649 = vmatpush1.bf16.msra.mxu1 %v1488_v27  ;;  %vm1387_vm4 = vcmp.ge.f32.partialorder %v2366_v9, 0.0 }
 0x204   : > { %vm1388_vm5 = vcmp.ge.f32.partialorder %v2367_v31, 0.0  ;;  %v1420_v35 = vmul.f32 0.2, %v2367_v31  ;;  %v1450_v19 = vsel %vm1386_vm3, %v2365_v52, %v1418_v17 }
 0x205   : > { %vm1389_vm6 = vcmp.ge.f32.partialorder %v2368_v29, 0.0  ;;  %v1421_v20 = vmul.f32 0.2, %v2368_v29  ;;  %v1451_v2 = vsel %vm1387_vm4, %v2366_v9, %v1419_v28 }
 0x206   : > { %v1452_v36 = vsel %vm1388_vm5, %v2367_v31, %v1420_v35 }
 0x207   : > { %v1341_v39 = vpop.f32.mrb[20].mxu0  ;;  %v1453_v12 = vsel %vm1389_vm6, %v2368_v29, %v1421_v20  ;;  %v1490_v0 = vpack.c.bf16 %v1452_v36, %v1450_v19  ;;  %v1982_v19 = vpop.permute.xlu0 %1981 }
 0x208   : > { %v2369_v32 = vadd.f32 %v1341_v39, %v3958_v58  ;;  %v1343_v44 = vpop.f32.mrb[21].mxu0  ;;  %v1491_v45 = vpack.c.bf16 %v1453_v12, %v1451_v2 }
 0x209   : > { %v2370_v23 = vadd.f32 %v1343_v44, %v3958_v58  ;;  %v1345_v49 = vpop.f32.mrb[22].mxu0 }
 0x20a   : > { %v1422_v50 = vmul.f32 0.2, %v2369_v32  ;;  %v2371_v51 = vadd.f32 %v1345_v49, %v3960_v7  ;;  %v1347_v61 = vpop.f32.mrb[23].mxu0  ;;  %1650 = vmatprep.subr.bf16.mxu1 %v1491_v45  ;;  %vm1390_vm7 = vcmp.ge.f32.partialorder %v2369_v32, 0.0 }
 0x20b   : > { %v1423_v3 = vmul.f32 0.2, %v2370_v23  ;;  %v2372_v4 = vadd.f32 %v1347_v61, %v3960_v7  ;;  %1651 = vmatpush1.bf16.msra.mxu1 %v1490_v0  ;;  %vm1391_vm8 = vcmp.ge.f32.partialorder %v2370_v23, 0.0  ;;  %v1990_v0 = vpop.permute.xlu1 %1989  ;;  %v2012_v61 = vsel %vm614_vm0, %v3980_v24, %v3974_v38 }
 0x20c   : > { %vm1392_vm9 = vcmp.ge.f32.partialorder %v2371_v51, 0.0  ;;  %v1424_v18 = vmul.f32 0.2, %v2371_v51  ;;  %v1454_v54 = vsel %vm1390_vm7, %v2369_v32, %v1422_v50  ;;  %v1992_v50 = vpop.permute.xlu0 %1991 }
 0x20d   : > { %vm1393_vm10 = vcmp.ge.f32.partialorder %v2372_v4, 0.0  ;;  %v1425_v26 = vmul.f32 0.2, %v2372_v4  ;;  %v1455_v62 = vsel %vm1391_vm8, %v2370_v23, %v1423_v3 }
 0x20e   : > { %v1456_v58 = vsel %vm1392_vm9, %v2371_v51, %v1424_v18  ;;  %v2013_v51 = vsel %vm614_vm0, %v3974_v38, %v3978_v13  ;;  %v2014_v13 = vsel %vm614_vm0, %v3991_v46, %v3985_v14  ;;  %v2017_v38 = vsel %vm614_vm0, %v3996_v6, %v3998_v55 }
 0x20f   : > { %v1351_v59 = vpop.f32.mrb[24].mxu0  ;;  %v1457_v33 = vsel %vm1393_vm10, %v2372_v4, %v1425_v26  ;;  %v1492_v10 = vpack.c.bf16 %v1456_v58, %v1454_v54  ;;  %v1988_v3 = vpop.permute.xlu1 %1987  ;;  %v2015_v4 = vsel %vm614_vm0, %v3985_v14, %v3988_v40  ;;  %v2829_v26 = vld [vmem:[%s4224_s3 + $0x8] sm:$0xff]   ;;  %v2016_v40 = vsel %vm614_vm0, %v4002_v48, %v3996_v6  ;;  %v2830_v6 = vld [vmem:[%s4224_s3 + $0x10] sm:$0xff]  }
 0x210   : > { %v2373_v30 = vadd.f32 %v1351_v59, %v3962_v21  ;;  %v1353_v34 = vpop.f32.mrb[25].mxu0  ;;  %v1493_v7 = vpack.c.bf16 %v1457_v33, %v1455_v62  ;;  %v1996_v18 = vpop.permute.xlu0 %1995  ;;  %v2019_v14 = vsel %vm614_vm0, %v4006_v53, %v1986_v15  ;;  %v2018_v46 = vsel %vm614_vm0, %v1982_v19, %v4006_v53  ;;  %v2835_v53 = vld [vmem:[%s4224_s3 + $0x38] sm:$0xff]  }
 0x211   : > { %v2374_v60 = vadd.f32 %v1353_v34, %v3962_v21  ;;  %v1355_v37 = vpop.f32.mrb[26].mxu0  ;;  %v2021_v55 = vsel %vm614_vm0, %v1990_v0, %v1992_v50  ;;  %v2020_v62 = vsel %vm614_vm0, %v1988_v3, %v1990_v0  ;;  %v2843_v15 = vld [vmem:[%s4226_s5 + $0x38] sm:$0xff]  }
 0x212   : > { %v1426_v41 = vmul.f32 0.2, %v2373_v30  ;;  %v2375_v22 = vadd.f32 %v1355_v37, %v3964_v5  ;;  %v1357_v42 = vpop.f32.mrb[27].mxu0  ;;  %1652 = vmatprep.subr.bf16.mxu1 %v1493_v7  ;;  %vm1394_vm11 = vcmp.ge.f32.partialorder %v2373_v30, 0.0 }
 0x213   : > { %v1427_v43 = vmul.f32 0.2, %v2374_v60  ;;  %v2376_v63 = vadd.f32 %v1357_v42, %v3964_v5  ;;  %1653 = vmatpush1.bf16.msra.mxu1 %v1492_v10  ;;  %vm1395_vm12 = vcmp.ge.f32.partialorder %v2374_v60, 0.0  ;;  %v1998_v24 = vpop.permute.xlu1 %1997 }
 0x214   : > { %vm1396_vm13 = vcmp.ge.f32.partialorder %v2375_v22, 0.0  ;;  %v1428_v16 = vmul.f32 0.2, %v2375_v22  ;;  %v1458_v8 = vsel %vm1394_vm11, %v2373_v30, %v1426_v41  ;;  %v1994_v54 = vpop.permute.xlu0 %1993  ;;  %v2023_v33 = vsel %vm614_vm0, %v1996_v18, %v1998_v24 }
 0x215   : > { %vm1397_vm14 = vcmp.ge.f32.partialorder %v2376_v63, 0.0  ;;  %v1429_v21 = vmul.f32 0.2, %v2376_v63  ;;  %v1459_v56 = vsel %vm1395_vm12, %v2374_v60, %v1427_v43  ;;  %v2022_v30 = vsel %vm614_vm0, %v1994_v54, %v1996_v18  ;;  %v2831_v60 = vld [vmem:[%s4224_s3 + $0x18] sm:$0xff]   ;;  %v2832_v43 = vld [vmem:[%s4224_s3 + $0x20] sm:$0xff]  }
 0x216   : > { %v1460_v27 = vsel %vm1396_vm13, %v2375_v22, %v1428_v16  ;;  %v2834_v16 = vld [vmem:[%s4224_s3 + $0x30] sm:$0xff]  }
 0x217   : > { %v1361_v52 = vpop.f32.mrb[28].mxu0  ;;  %v1461_v47 = vsel %vm1397_vm14, %v2376_v63, %v1429_v21  ;;  %v1494_v9 = vpack.c.bf16 %v1460_v27, %v1458_v8  ;;  %v2002_v58 = vpop.permute.xlu1 %2001  ;;  %v2833_v63 = vld [vmem:[%s4224_s3 + $0x28] sm:$0xff]   ;;  %v2836_v21 = vld [vmem:[%s4226_s5] sm:$0xff]   ;;  %v2838_v27 = vld [vmem:[%s4226_s5 + $0x10] sm:$0xff]  }
 0x218   : > { %v2377_v17 = vadd.f32 %v1361_v52, %v3968_v57  ;;  %v1363_v31 = vpop.f32.mrb[29].mxu0  ;;  %v1495_v25 = vpack.c.bf16 %v1461_v47, %v1459_v56  ;;  %v2004_v59 = vpop.permute.xlu0 %2003  ;;  %v2837_v8 = vld [vmem:[%s4226_s5 + $0x8] sm:$0xff]   ;;  %v2839_v52 = vld [vmem:[%s4226_s5 + $0x18] sm:$0xff]   ;;  %v2840_v56 = vld [vmem:[%s4226_s5 + $0x20] sm:$0xff]  }
 0x219   : > { %v2378_v5 = vadd.f32 %v1363_v31, %v3968_v57  ;;  %v1365_v28 = vpop.f32.mrb[30].mxu0  ;;  %v2025_v7 = vsel %vm614_vm0, %v2002_v58, %v2004_v59  ;;  %v2841_v47 = vld [vmem:[%s4226_s5 + $0x28] sm:$0xff]  }
 0x21a   : > { %v1430_v29 = vmul.f32 0.2, %v2377_v17  ;;  %v2379_v35 = vadd.f32 %v1365_v28, %v3970_v11  ;;  %v1367_v20 = vpop.f32.mrb[31].mxu0  ;;  %1654 = vmatprep.subr.bf16.mxu1 %v1495_v25  ;;  %vm1398_vm15 = vcmp.ge.f32.partialorder %v2377_v17, 0.0 }
 0x21b   : > { %v1431_v36 = vmul.f32 0.2, %v2378_v5  ;;  %v2380_v39 = vadd.f32 %v1367_v20, %v3970_v11  ;;  %1655 = vmatpush1.bf16.msra.mxu1 %v1494_v9  ;;  %vm1399_vm1 = vcmp.ge.f32.partialorder %v2378_v5, 0.0  ;;  %v2828_v11 = vld [vmem:[%s4224_s3] sm:$0xff]   ;;  %v2000_v10 = vpop.permute.xlu1 %1999  ;;  %v2842_v9 = vld [vmem:[%s4226_s5 + $0x30] sm:$0xff]  }
 0x21c   : > { %vm1400_vm2 = vcmp.ge.f32.partialorder %v2379_v35, 0.0  ;;  %v1432_v2 = vmul.f32 0.2, %v2379_v35  ;;  %v1462_v32 = vsel %vm1398_vm15, %v2377_v17, %v1430_v29  ;;  %v2008_v34 = vpop.permute.xlu0 %2007  ;;  %v2024_v37 = vsel %vm614_vm0, %v2000_v10, %v2002_v58 }
 0x21d   : > { %vm1401_vm3 = vcmp.ge.f32.partialorder %v2380_v39, 0.0  ;;  %v1433_v12 = vmul.f32 0.2, %v2380_v39  ;;  %v1463_v44 = vsel %vm1399_vm1, %v2378_v5, %v1431_v36 }
 0x21e   : > { %v1464_v57 = vsel %vm1400_vm2, %v2379_v35, %v1432_v2 }
 0x21f   : > { %v1465_v45 = vsel %vm1401_vm3, %v2380_v39, %v1433_v12  ;;  %v1496_v23 = vpack.c.bf16 %v1464_v57, %v1462_v32  ;;  %v2010_v48 = vpop.permute.xlu1 %2009 }
 0x220   : > { %v1497_v49 = vpack.c.bf16 %v1465_v45, %v1463_v44  ;;  %v2027_v41 = vsel %vm614_vm0, %v2008_v34, %v2010_v48  ;;  %v2006_v22 = vpop.permute.xlu0 %2005 }
 0x221   : > { %v2026_v42 = vsel %vm614_vm0, %v2006_v22, %v2008_v34 }
 0x222   : > { %1656 = vmatprep.subr.bf16.mxu1 %v1497_v49 }
 0x223   : > { %1657 = vmatpush1.bf16.msra.mxu1 %v1496_v23  ;;  %v1517_v17 = vpop.permute.xlu1 %1516 }
 0x224   : > { %2044 = vmatprep.subr.bf16.mxu1 %v2013_v51  ;;  %v1522_v31 = vpop.permute.xlu0 %1521 }
 0x226   : > { %1675 = vmatmul.mubr.bf16.vlgmr.msra.gmra.mrb[0].mxu1 %v2828_v11 }
 0x227   : > { %2045 = vmatpush1.bf16.msra.mxu1 %v2012_v61  ;;  %1684 = vmatprep.mubr.bf16.mxu1 %v2910_v1  ;;  %v1527_v25 = vpop.permute.xlu1 %1526 }
 0x228   : > { %2046 = vmatprep.subr.bf16.mxu1 %v2015_v4  ;;  %v1532_v5 = vpop.permute.xlu0 %1531 }
 0x22b   : > { %2047 = vmatpush1.bf16.msra.mxu1 %v2014_v13  ;;  %v1537_v28 = vpop.permute.xlu1 %1536 }
 0x22c   : > { %2048 = vmatprep.subr.bf16.mxu1 %v2017_v38  ;;  %v1542_v29 = vpop.permute.xlu0 %1541 }
 0x22e   : > { %1685 = vmatmul.mubr.bf16.gmra.mrb[4].mxu1 %v2829_v26 }
 0x22f   : > { %1694 = vmatprep.mubr.bf16.mxu1 %v2910_v1  ;;  %2049 = vmatpush1.bf16.msra.mxu1 %v2016_v40  ;;  %v1547_v35 = vpop.permute.xlu1 %1546 }
 0x230   : > { %2050 = vmatprep.subr.bf16.mxu1 %v2019_v14  ;;  %v4105_v20 = vpop.permute.xlu0 %1551 }
 0x233   : > { %2051 = vmatpush1.bf16.msra.mxu1 %v2018_v46  ;;  %v4107_v19 = vpop.permute.xlu1 %1556 }
 0x234   : > { %2052 = vmatprep.subr.bf16.mxu1 %v2021_v55  ;;  %v4109_v36 = vpop.permute.xlu0 %1561 }
 0x236   : > { %1695 = vmatmul.mubr.bf16.gmra.mrb[8].mxu1 %v2830_v6 }
 0x237   : > { %1704 = vmatprep.mubr.bf16.mxu1 %v2910_v1  ;;  %2053 = vmatpush1.bf16.msra.mxu1 %v2020_v62 }
 0x238   : > { %2054 = vmatprep.subr.bf16.mxu1 %v2023_v33  ;;  %v4113_v39 = vpop.permute.xlu0 %1571 }
 0x23b   : > { %2055 = vmatpush1.bf16.msra.mxu1 %v2022_v30 }
 0x23c   : > { %2056 = vmatprep.subr.bf16.mxu1 %v2025_v7  ;;  %v4117_v12 = vpop.permute.xlu0 %1581 }
 0x23e   : > { %1705 = vmatmul.mubr.bf16.gmra.mrb[12].mxu1 %v2831_v60 }
 0x23f   : > { %1714 = vmatprep.mubr.bf16.mxu1 %v2910_v1  ;;  %2057 = vmatpush1.bf16.msra.mxu1 %v2024_v37 }
 0x240   : > { %2058 = vmatprep.subr.bf16.mxu1 %v2027_v41  ;;  %v4121_v32 = vpop.permute.xlu0 %1591 }
 0x243   : > { %2059 = vmatpush1.bf16.msra.mxu1 %v2026_v42 }
 0x244   : > { %v1819_v45 = vpop.permute.xlu0 %1818 }
 0x245   : > { %v2385_v49 = vadd.f32 %v1819_v45, %v1522_v31 }
 0x246   : > { %1715 = vmatmul.mubr.bf16.gmra.mrb[16].mxu1 %v2832_v43 }
 0x247   : > { %1724 = vmatprep.mubr.bf16.mxu1 %v2910_v1 }
 0x248   : > { %v1829_v24 = vpop.permute.xlu0 %1828 }
 0x249   : > { %v2393_v40 = vadd.f32 %v1829_v24, %v1532_v5 }
 0x24c   : > { %v1839_v10 = vpop.permute.xlu0 %1838 }
 0x24d   : > { %v2401_v34 = vadd.f32 %v1839_v10, %v1542_v29 }
 0x24e   : > { %1725 = vmatmul.mubr.bf16.gmra.mrb[20].mxu1 %v2833_v63 }
 0x24f   : > { %1734 = vmatprep.mubr.bf16.mxu1 %v2910_v1 }
 0x256   : > { %1735 = vmatmul.mubr.bf16.gmra.mrb[24].mxu1 %v2834_v16  ;;  %v1849_v16 = vpop.permute.xlu0 %1848 }
 0x257   : > { %1744 = vmatprep.mubr.bf16.mxu1 %v2910_v1 }
 0x25e   : > { %1745 = vmatmul.mubr.bf16.gmra.mrb[28].mxu1 %v2835_v53 }
 0x25f   : > { %2076 = vmatprep.mubr.bf16.mxu1 %v2910_v1 }
 0x266   : > { %2077 = vmatmul.mubr.bf16.vlgmr.msra.gmra.mrb[0].mxu1 %v2836_v21  ;;  %v2409_v21 = vadd.f32 %v1849_v16, %v4105_v20 }
 0x267   : > { %2086 = vmatprep.mubr.bf16.mxu1 %v2910_v1 }
 0x26e   : > { %2087 = vmatmul.mubr.bf16.gmra.mrb[4].mxu1 %v2837_v8 }
 0x26f   : > { %2096 = vmatprep.mubr.bf16.mxu1 %v2910_v1 }
 0x276   : > { %2097 = vmatmul.mubr.bf16.gmra.mrb[8].mxu1 %v2838_v27 }
 0x277   : > { %2106 = vmatprep.mubr.bf16.mxu1 %v2910_v1 }
 0x27e   : > { %2107 = vmatmul.mubr.bf16.gmra.mrb[12].mxu1 %v2839_v52 }
 0x27f   : > { %2116 = vmatprep.mubr.bf16.mxu1 %v2910_v1 }
 0x286   : > { %2117 = vmatmul.mubr.bf16.gmra.mrb[16].mxu1 %v2840_v56 }
 0x287   : > { %2126 = vmatprep.mubr.bf16.mxu1 %v2910_v1 }
 0x28e   : > { %2127 = vmatmul.mubr.bf16.gmra.mrb[20].mxu1 %v2841_v47 }
 0x28f   : > { %2136 = vmatprep.mubr.bf16.mxu1 %v2910_v1 }
 0x296   : > { %2137 = vmatmul.mubr.bf16.gmra.mrb[24].mxu1 %v2842_v9 }
 0x297   : > { %2146 = vmatprep.mubr.bf16.mxu1 %v2910_v1  ;;  %v4111_v1 = vpop.permute.xlu1 %1566 }
 0x29b   : > { %v4115_v2 = vpop.permute.xlu1 %1576 }
 0x29e   : > { %2147 = vmatmul.mubr.bf16.gmra.mrb[28].mxu1 %v2843_v15 }
 0x29f   : > { %v4119_v0 = vpop.permute.xlu1 %1586 }
 0x2a3   : > { %v1814_v57 = vpop.permute.xlu1 %1813 }
 0x2a4   : > { %v2381_v44 = vadd.f32 %v1814_v57, %v1517_v17 }
 0x2a7   : > { %v1824_v13 = vpop.permute.xlu1 %1823 }
 0x2a8   : > { %v2389_v38 = vadd.f32 %v1824_v13, %v1527_v25  ;;  %v1859_v25 = vpop.permute.xlu0 %1858 }
 0x2ab   : > { %v1834_v62 = vpop.permute.xlu1 %1833 }
 0x2ac   : > { %v2397_v33 = vadd.f32 %v1834_v62, %v1537_v28  ;;  %v2417_v28 = vadd.f32 %v1859_v25, %v4109_v36 }
 0x2af   : > { %v1844_v43 = vpop.permute.xlu1 %1843 }
 0x2b0   : > { %v2405_v63 = vadd.f32 %v1844_v43, %v1547_v35 }
 0x2b3   : > { %v1854_v17 = vpop.permute.xlu1 %1853 }
 0x2b4   : > { %v2413_v31 = vadd.f32 %v1854_v17, %v4107_v19 }
 0x339   : > { %v2078_v23 = vpop.f32.mrb[0].mxu1 }
 0x33a   : > { %v2382_v50 = vadd.f32 %v2381_v44, %v2078_v23  ;;  %v2080_v51 = vpop.f32.mrb[1].mxu1 }
 0x33b   : > { %v2384_v11 = vadd.f32 %v2381_v44, %v2080_v51  ;;  %v2082_v61 = vpop.f32.mrb[2].mxu1 }
 0x33c   : > { %2189 = vst [vmem:[%s4126_s19] sm:$0xff] %v2382_v50  ;;  %v2386_v3 = vadd.f32 %v2385_v49, %v2082_v61  ;;  %v2084_v4 = vpop.f32.mrb[3].mxu1  ;;  %v1869_v50 = vpop.permute.xlu0 %1868 }
 0x33d   : > { %2190 = vst [vmem:[%s4126_s19 + $0x8] sm:$0xff] %v2384_v11  ;;  %v2388_v18 = vadd.f32 %v2385_v49, %v2084_v4  ;;  %v1864_v49 = vpop.permute.xlu1 %1863  ;;  %v2425_v51 = vadd.f32 %v1869_v50, %v4113_v39 }
 0x33e   : > { %2191 = vst [vmem:[%s4126_s19 + $0x10] sm:$0xff] %v2386_v3  ;;  %v2421_v19 = vadd.f32 %v1864_v49, %v4111_v1 }
 0x33f   : > { %2192 = vst [vmem:[%s4126_s19 + $0x18] sm:$0xff] %v2388_v18 }
 0x341   : > { %v2088_v26 = vpop.f32.mrb[4].mxu1  ;;  %v1874_v24 = vpop.permute.xlu1 %1873 }
 0x342   : > { %v2390_v54 = vadd.f32 %v2389_v38, %v2088_v26  ;;  %v2090_v14 = vpop.f32.mrb[5].mxu1  ;;  %v2429_v1 = vadd.f32 %v1874_v24, %v4115_v2  ;;  %v1879_v26 = vpop.permute.xlu0 %1878 }
 0x343   : > { %v2392_v46 = vadd.f32 %v2389_v38, %v2090_v14  ;;  %v2092_v58 = vpop.f32.mrb[6].mxu1 }
 0x344   : > { %2193 = vst [vmem:[%s4126_s19 + $0x20] sm:$0xff] %v2390_v54  ;;  %v2394_v55 = vadd.f32 %v2393_v40, %v2092_v58  ;;  %v2094_v6 = vpop.f32.mrb[7].mxu1 }
 0x345   : > { %2194 = vst [vmem:[%s4126_s19 + $0x28] sm:$0xff] %v2392_v46  ;;  %v2396_v59 = vadd.f32 %v2393_v40, %v2094_v6  ;;  %v2433_v40 = vadd.f32 %v1879_v26, %v4117_v12 }
 0x346   : > { %2195 = vst [vmem:[%s4126_s19 + $0x30] sm:$0xff] %v2394_v55  ;;  %v1889_v2 = vpop.permute.xlu0 %1888 }
 0x347   : > { %2196 = vst [vmem:[%s4126_s19 + $0x38] sm:$0xff] %v2396_v59  ;;  %v1884_v59 = vpop.permute.xlu1 %1883  ;;  %v2441_v10 = vadd.f32 %v1889_v2, %v4121_v32 }
 0x349   : > { %v2098_v30 = vpop.f32.mrb[8].mxu1 }
 0x34a   : > { %v2398_v7 = vadd.f32 %v2397_v33, %v2098_v30  ;;  %v2100_v60 = vpop.f32.mrb[9].mxu1 }
 0x34b   : > { %v2400_v37 = vadd.f32 %v2397_v33, %v2100_v60  ;;  %v2102_v48 = vpop.f32.mrb[10].mxu1  ;;  %v2437_v33 = vadd.f32 %v1884_v59, %v4119_v0 }
 0x34c   : > { %2197 = vst [vmem:[%s4126_s19 + $0x40] sm:$0xff] %v2398_v7  ;;  %v2402_v41 = vadd.f32 %v2401_v34, %v2102_v48  ;;  %v2104_v22 = vpop.f32.mrb[11].mxu1 }
 0x34d   : > { %2198 = vst [vmem:[%s4126_s19 + $0x48] sm:$0xff] %v2400_v37  ;;  %v2404_v42 = vadd.f32 %v2401_v34, %v2104_v22 }
 0x34e   : > { %2199 = vst [vmem:[%s4126_s19 + $0x50] sm:$0xff] %v2402_v41 }
 0x34f   : > { %2200 = vst [vmem:[%s4126_s19 + $0x58] sm:$0xff] %v2404_v42 }
 0x351   : > { %v2108_v53 = vpop.f32.mrb[12].mxu1 }
 0x352   : > { %v2406_v8 = vadd.f32 %v2405_v63, %v2108_v53  ;;  %v2110_v27 = vpop.f32.mrb[13].mxu1 }
 0x353   : > { %v2408_v52 = vadd.f32 %v2405_v63, %v2110_v27  ;;  %v2112_v56 = vpop.f32.mrb[14].mxu1 }
 0x354   : > { %2201 = vst [vmem:[%s4126_s19 + $0x60] sm:$0xff] %v2406_v8  ;;  %v2410_v47 = vadd.f32 %v2409_v21, %v2112_v56  ;;  %v2114_v9 = vpop.f32.mrb[15].mxu1 }
 0x355   : > { %2202 = vst [vmem:[%s4126_s19 + $0x68] sm:$0xff] %v2408_v52  ;;  %v2412_v15 = vadd.f32 %v2409_v21, %v2114_v9 }
 0x356   : > { %2203 = vst [vmem:[%s4126_s19 + $0x70] sm:$0xff] %v2410_v47 }
 0x357   : > { %2204 = vst [vmem:[%s4126_s19 + $0x78] sm:$0xff] %v2412_v15 }
 0x359   : > { %v2118_v5 = vpop.f32.mrb[16].mxu1 }
 0x35a   : > { %v2414_v29 = vadd.f32 %v2413_v31, %v2118_v5  ;;  %v2120_v35 = vpop.f32.mrb[17].mxu1 }
 0x35b   : > { %v2416_v20 = vadd.f32 %v2413_v31, %v2120_v35  ;;  %v2122_v57 = vpop.f32.mrb[18].mxu1 }
 0x35c   : > { %2205 = vst [vmem:[%s4126_s19 + $0x80] sm:$0xff] %v2414_v29  ;;  %v2418_v44 = vadd.f32 %v2417_v28, %v2122_v57  ;;  %v2124_v45 = vpop.f32.mrb[19].mxu1 }
 0x35d   : > { %2206 = vst [vmem:[%s4126_s19 + $0x88] sm:$0xff] %v2416_v20  ;;  %v2420_v23 = vadd.f32 %v2417_v28, %v2124_v45 }
 0x35e   : > { %2207 = vst [vmem:[%s4126_s19 + $0x90] sm:$0xff] %v2418_v44 }
 0x35f   : > { %2208 = vst [vmem:[%s4126_s19 + $0x98] sm:$0xff] %v2420_v23 }
 0x361   : > { %v2128_v36 = vpop.f32.mrb[20].mxu1 }
 0x362   : > { %v2422_v11 = vadd.f32 %v2421_v19, %v2128_v36  ;;  %v2130_v61 = vpop.f32.mrb[21].mxu1 }
 0x363   : > { %v2424_v3 = vadd.f32 %v2421_v19, %v2130_v61  ;;  %v2132_v4 = vpop.f32.mrb[22].mxu1 }
 0x364   : > { %2209 = vst [vmem:[%s4126_s19 + $0xa0] sm:$0xff] %v2422_v11  ;;  %v2426_v18 = vadd.f32 %v2425_v51, %v2132_v4  ;;  %v2134_v13 = vpop.f32.mrb[23].mxu1 }
 0x365   : > { %2210 = vst [vmem:[%s4126_s19 + $0xa8] sm:$0xff] %v2424_v3  ;;  %v2428_v38 = vadd.f32 %v2425_v51, %v2134_v13 }
 0x366   : > { %2211 = vst [vmem:[%s4126_s19 + $0xb0] sm:$0xff] %v2426_v18 }
 0x367   : > { %2212 = vst [vmem:[%s4126_s19 + $0xb8] sm:$0xff] %v2428_v38 }
 0x369   : > { %v2138_v39 = vpop.f32.mrb[24].mxu1 }
 0x36a   : > { %v2430_v54 = vadd.f32 %v2429_v1, %v2138_v39  ;;  %v2140_v14 = vpop.f32.mrb[25].mxu1 }
 0x36b   : > { %v2432_v46 = vadd.f32 %v2429_v1, %v2140_v14  ;;  %v2142_v58 = vpop.f32.mrb[26].mxu1 }
 0x36c   : > { %2213 = vst [vmem:[%s4126_s19 + $0xc0] sm:$0xff] %v2430_v54  ;;  %v2434_v55 = vadd.f32 %v2433_v40, %v2142_v58  ;;  %v2144_v6 = vpop.f32.mrb[27].mxu1 }
 0x36d   : > { %2214 = vst [vmem:[%s4126_s19 + $0xc8] sm:$0xff] %v2432_v46  ;;  %v2436_v62 = vadd.f32 %v2433_v40, %v2144_v6 }
 0x36e   : > { %2215 = vst [vmem:[%s4126_s19 + $0xd0] sm:$0xff] %v2434_v55 }
 0x36f   : > { %2216 = vst [vmem:[%s4126_s19 + $0xd8] sm:$0xff] %v2436_v62 }
 0x371   : > { %v2148_v12 = vpop.f32.mrb[28].mxu1 }
 0x372   : > { %v2438_v30 = vadd.f32 %v2437_v33, %v2148_v12  ;;  %v2150_v34 = vpop.f32.mrb[29].mxu1 }
 0x373   : > { %v2440_v7 = vadd.f32 %v2437_v33, %v2150_v34  ;;  %v2152_v60 = vpop.f32.mrb[30].mxu1 }
 0x374   : > { %2217 = vst [vmem:[%s4126_s19 + $0xe0] sm:$0xff] %v2438_v30  ;;  %v2442_v37 = vadd.f32 %v2441_v10, %v2152_v60  ;;  %v2154_v48 = vpop.f32.mrb[31].mxu1 }
 0x375   : > { %2218 = vst [vmem:[%s4126_s19 + $0xe8] sm:$0xff] %v2440_v7  ;;  %v2444_v0 = vadd.f32 %v2441_v10, %v2154_v48 }
 0x376   : > { %2219 = vst [vmem:[%s4126_s19 + $0xf0] sm:$0xff] %v2442_v37 }
 0x377   : > { %2220 = vst [vmem:[%s4126_s19 + $0xf8] sm:$0xff] %v2444_v0 }
 0x378   : > { %2857 = shalt.err (!%p2854_p3)
}
 0x379   : > { %s2858_s18 = scalar_lea.hbm %s4171_s29, 4096  ;;  %s2862_s17 = scalar_lea.hbm %s4228_s7, 8192 }
 0x37a   : > { %p2859_p4 = scmp.ne.s32.totalorder %s4171_s29, %s2858_s18  ;;  %p2863_p9 = scmp.lt.u32.totalorder %s4171_s29, %s4228_s7 }
 0x37b   : > { %p2864_p10 = scmp.lt.u32.totalorder %s2862_s17, %s2858_s18  ;;  %p2866_p12 = scmp.lt.u32.totalorder %s2858_s18, %s4171_s29 }
 0x37c   : > { %p2860_p7 = pnand %p2859_p4, %p2992_p5 }
 0x37d   : > { %p2865_p11 = por %p2864_p10, %p2863_p9 }
 0x37e   : > { %p2861_p8 = pneg %p2860_p7 }
 0x37f   : > { %p2867_p13 = por %p2866_p12, %p2865_p11 }
 0x381   : > { %p2868_p0 = pnand %p2867_p13, %p2861_p8 }
 0x383   : > { %2871 = shalt.err (!%p2868_p0)
}
 0x384   : > { %s2912_s22 = smov 256   ;;  %s2913_s23 = smov 16  }
 0x385   : > { %2510 = dma.vmem_to_hbm [thread:$0]  (%p2992_p5), %s4173_s21, 4096, %s4171_s29, %s4180_s28, %s2912_s22, %s2912_s22, %s2913_s23  }
 0x386 PF: > { %p2516_p1 = scmp.ge.s32.totalorder %s2906_s27, 2  ;;  %s2250_s8 = sand.u32 1, %s2894_s24  }
 0x387   : > { %s2251_s9 = scalar_lea.sflag [#allocation3], %s2250_s8 }
 0x388   : > { %p2513_p2 = pnand %p2516_p1, %p2996_p6 }
 0x38a   : > { %2889 = dma.done.wait (!%p2513_p2), %s2251_s9, 4096  }
 0x38b   : > { %2891 = vsyncadd (!%p2513_p2), %s2251_s9, 4294963200  ;;  %p17_p3 = scmp.ge.s32.totalorder %s2979_s30, 4   ;;  %s4366_s24 = smov %s2898_s25 }
 0x38c   : > { %s4367_s25 = smov %s2902_s26  ;;  %s4368_s26 = smov %s2990_s10 }
 0x38d   : > { %s4369_s27 = smov %s2979_s30  ;;  %19 = sbr.rel (!%p17_p3) target bundleno = 3 (0x3), region = 83 }
 0x394   :  { %2256 = vsyncpa [#allocation3], 1 }
 0x395   :  { %2258 = vsyncpa [#allocation3 + $0x1], 1 }

</bundles_post_ra>
